<compile_context>
chip_gen: v5e
topology: v5e:2x2
jax: 0.10.0
libtpu: 0.0.40
codegen_flags: <defaults>
</compile_context>

<pallas_src>
import functools

import jax
import jax.numpy as jnp
from jax.experimental import pallas as pl
from jax.experimental.pallas import tpu as pltpu

# ---- packed-parameter slab layout (rows of a (SLAB_ROWS, 128) f32 array) ----
LANES = 128
W1_ROW = 0       # rows 0:2   -> W1 (2, 32) in lanes 0:32
B_ROW = 8        # row 8 = b1(32), row 9 = b2(8), row 10 = b3(16), row 11 = b4(A)
W2_ROW = 16      # rows 16:48 -> W2 (32, 8)  in lanes 0:8
W3_ROW = 48      # rows 48:56 -> W3 (8, 16)  in lanes 0:16
W4_ROW = 56      # rows 56:72 -> W4 (16, A)  in lanes 0:A
SLAB_ROWS = 72   # multiple of 8 sublanes


def _mlp_kernel(x_ref, p_ref, o_ref, *, num_actions):
    x = x_ref[...]                                # (TB, 2) f32

    w1 = p_ref[W1_ROW:W1_ROW + 2, :]              # (2, 128), valid lanes 0:32
    b1 = p_ref[B_ROW + 0:B_ROW + 1, :]            # (1, 128)
    b2 = p_ref[B_ROW + 1:B_ROW + 2, :]
    b3 = p_ref[B_ROW + 2:B_ROW + 3, :]
    b4 = p_ref[B_ROW + 3:B_ROW + 4, :]

    # Layer 1: Linear(2, 32) + ReLU as a VPU broadcast-FMA (K=2 is too small for MXU).
    # Padded lanes (>=32) stay exactly zero because w1 / b1 are zero there.
    y = x[:, 0:1] * w1[0:1, :] + x[:, 1:2] * w1[1:2, :] + b1
    y = jnp.maximum(y, 0.0)                       # (TB, 128)

    # Layer 2: Linear(32, 8) + ReLU — K sliced to the true contraction width.
    y = jnp.dot(y[:, :32], p_ref[W2_ROW:W2_ROW + 32, :],
                preferred_element_type=jnp.float32) + b2
    y = jnp.maximum(y, 0.0)                       # lanes >= 8 exactly zero

    # Layer 3: Linear(8, 16) + ReLU
    y = jnp.dot(y[:, :8], p_ref[W3_ROW:W3_ROW + 8, :],
                preferred_element_type=jnp.float32) + b3
    y = jnp.maximum(y, 0.0)                       # lanes >= 16 exactly zero

    # Layer 4: Linear(16, num_actions)  (no activation, matches the ModuleList)
    y = jnp.dot(y[:, :16], p_ref[W4_ROW:W4_ROW + 16, :],
                preferred_element_type=jnp.float32) + b4

    # Lane-narrow store: block spans the full last dim (num_actions), so writeback
    # DMA only carries num_actions lanes of HBM traffic.
    o_ref[...] = y[:, :num_actions].astype(o_ref.dtype)


def pack_params(params, num_actions):
    """Pack all weights/biases into one lane-padded (SLAB_ROWS, 128) f32 slab."""
    slab = jnp.zeros((SLAB_ROWS, LANES), jnp.float32)
    slab = slab.at[W1_ROW:W1_ROW + 2, 0:32].set(params["w1"])
    slab = slab.at[B_ROW + 0, 0:32].set(params["b1"][0])
    slab = slab.at[B_ROW + 1, 0:8].set(params["b2"][0])
    slab = slab.at[B_ROW + 2, 0:16].set(params["b3"][0])
    slab = slab.at[B_ROW + 3, 0:num_actions].set(params["b4"][0])
    slab = slab.at[W2_ROW:W2_ROW + 32, 0:8].set(params["w2"])
    slab = slab.at[W3_ROW:W3_ROW + 8, 0:16].set(params["w3"])
    slab = slab.at[W4_ROW:W4_ROW + 16, 0:num_actions].set(params["w4"])
    return slab


def _round_up(n, m):
    return ((n + m - 1) // m) * m


@functools.partial(jax.jit, static_argnames=("num_actions", "tb"))
def deep_grid_learner_2d(x, slab, num_actions, tb=1024):
    """Forward pass. x: (B, 2) f32, slab: packed params. Returns (B, num_actions)."""
    B = x.shape[0]
    # Big tiles amortise per-step pipeline overhead; clamp at 2048 so double-buffered
    # x/out blocks plus live (tb, 128) activations stay well under v5e's scoped VMEM,
    # and don't pad tiny batches up to a huge tile.
    tb_eff = max(8, min(tb, 2048, _round_up(B, 8)))
    n_tiles = pl.cdiv(B, tb_eff)
    Bp = n_tiles * tb_eff
    if Bp != B:                                   # pad batch to a full tile multiple
        x = jnp.pad(x, ((0, Bp - B), (0, 0)))

    flops = 2 * Bp * (2 * 32 + 32 * 8 + 8 * 16 + 16 * num_actions)
    bytes_accessed = (Bp * 2 * 4                  # x
                      + SLAB_ROWS * LANES * 4     # packed params (resident)
                      + Bp * num_actions * 4)     # narrow output

    kernel = functools.partial(_mlp_kernel, num_actions=num_actions)

    out = pl.pallas_call(
        kernel,
        out_shape=jax.ShapeDtypeStruct((Bp, num_actions), jnp.float32),
        grid=(n_tiles,),
        in_specs=[
            pl.BlockSpec((tb_eff, 2), lambda i: (i, 0)),             # x tile
            pl.BlockSpec((SLAB_ROWS, LANES), lambda i: (0, 0)),      # resident params
        ],
        out_specs=pl.BlockSpec((tb_eff, num_actions), lambda i: (i, 0)),
        compiler_params=pltpu.CompilerParams(
            dimension_semantics=("parallel",),
            vmem_limit_bytes=32 * 1024 * 1024),
        cost_estimate=pl.CostEstimate(
            flops=flops, transcendentals=0, bytes_accessed=bytes_accessed),
    )(x, slab)

    return out[:B]


def init_params(key, num_actions):
    """nn.Linear-style init; weights kept as (in, out), biases as (1, out)."""
    dims = [(2, 32), (32, 8), (8, 16), (16, num_actions)]
    params = {}
    for i, (fan_in, fan_out) in enumerate(dims, start=1):
        key, kw, kb = jax.random.split(key, 3)
        bound = 1.0 / jnp.sqrt(float(fan_in))
        params[f"w{i}"] = jax.random.uniform(
            kw, (fan_in, fan_out), jnp.float32, minval=-bound, maxval=bound)
        params[f"b{i}"] = jax.random.uniform(
            kb, (1, fan_out), jnp.float32, minval=-bound, maxval=bound)
    return params


def reference_forward(x, params):
    """Pure-JAX reference of the PyTorch forward (correctness check)."""
    y = x
    y = jnp.maximum(y @ params["w1"] + params["b1"], 0.0)
    y = jnp.maximum(y @ params["w2"] + params["b2"], 0.0)
    y = jnp.maximum(y @ params["w3"] + params["b3"], 0.0)
    y = y @ params["w4"] + params["b4"]
    return y


if __name__ == "__main__":
    key = jax.random.PRNGKey(0)
    key, kx = jax.random.split(key)

    num_actions = 4
    batch = 300  # non-multiple of 8 / 128: exercises the batch-padding path

    # Input: (batch, 2) grid coordinates, matching Linear(2, 32)'s input features.
    x = jax.random.uniform(kx, (batch, 2), jnp.float32, minval=0.0, maxval=1.0)

    params = init_params(key, num_actions)
    slab = pack_params(params, num_actions)
    ref = reference_forward(x, params)

    # Default path: one large tile (batch rounded up to a multiple of 8).
    out = jax.block_until_ready(deep_grid_learner_2d(x, slab, num_actions))
    assert out.shape == (batch, num_actions)
    assert jnp.allclose(out, ref, atol=1e-5, rtol=1e-5), "mismatch vs reference"

    # Multi-tile path: exercises padding + the parallel batch grid axis.
    out_tiled = jax.block_until_ready(
        deep_grid_learner_2d(x, slab, num_actions, tb=128))
    assert jnp.allclose(out_tiled, ref, atol=1e-5, rtol=1e-5), "tiled mismatch"

    print("KERNEL_OK")
</pallas_src>

<mosaic_0001>
module attributes {stable_mosaic.version = 11 : i64} {
  func.func @_mlp_kernel(%arg0: i32, %arg1: memref<304x2xf32, #tpu.memory_space<vmem>>, %arg2: memref<72x128xf32, #tpu.memory_space<vmem>>, %arg3: memref<304x4xf32, #tpu.memory_space<vmem>>) attributes {dimension_semantics = [#tpu.dimension_semantics<parallel>], iteration_bounds = array<i64: 1>, scalar_prefetch = 0 : i64, scratch_operands = 0 : i64, tpu.core_type = #tpu.core_type<tc>, window_params = [{transform_indices = @transform_0, window_bounds = array<i64: 304, 2>}, {pipeline_mode = #tpu.pipeline_mode<synchronous>, transform_indices = @transform_1, window_bounds = array<i64: 72, 128>}, {transform_indices = @transform_2, window_bounds = array<i64: 304, 4>}]} {
    %c0 = arith.constant 0 : index
    %c0_0 = arith.constant 0 : index
    %0 = vector.load %arg1[%c0, %c0_0] : memref<304x2xf32, #tpu.memory_space<vmem>>, vector<304x2xf32>
    %c0_1 = arith.constant 0 : index
    %c0_2 = arith.constant 0 : index
    %1 = vector.load %arg2[%c0_1, %c0_2] : memref<72x128xf32, #tpu.memory_space<vmem>>, vector<2x128xf32>
    %c8 = arith.constant 8 : index
    %c0_3 = arith.constant 0 : index
    %2 = vector.load %arg2[%c8, %c0_3] : memref<72x128xf32, #tpu.memory_space<vmem>>, vector<1x128xf32>
    %c9 = arith.constant 9 : index
    %c0_4 = arith.constant 0 : index
    %3 = vector.load %arg2[%c9, %c0_4] : memref<72x128xf32, #tpu.memory_space<vmem>>, vector<1x128xf32>
    %c10 = arith.constant 10 : index
    %c0_5 = arith.constant 0 : index
    %4 = vector.load %arg2[%c10, %c0_5] : memref<72x128xf32, #tpu.memory_space<vmem>>, vector<1x128xf32>
    %c11 = arith.constant 11 : index
    %c0_6 = arith.constant 0 : index
    %5 = vector.load %arg2[%c11, %c0_6] : memref<72x128xf32, #tpu.memory_space<vmem>>, vector<1x128xf32>
    %6 = vector.extract_strided_slice %0 {offsets = [0, 0], sizes = [304, 1], strides = [1, 1]} : vector<304x2xf32> to vector<304x1xf32>
    %7 = vector.extract_strided_slice %1 {offsets = [0, 0], sizes = [1, 128], strides = [1, 1]} : vector<2x128xf32> to vector<1x128xf32>
    %8 = vector.broadcast %6 : vector<304x1xf32> to vector<304x128xf32>
    %9 = vector.broadcast %7 : vector<1x128xf32> to vector<304x128xf32>
    %10 = arith.mulf %8, %9 : vector<304x128xf32>
    %11 = vector.extract_strided_slice %0 {offsets = [0, 1], sizes = [304, 1], strides = [1, 1]} : vector<304x2xf32> to vector<304x1xf32>
    %12 = vector.extract_strided_slice %1 {offsets = [1, 0], sizes = [1, 128], strides = [1, 1]} : vector<2x128xf32> to vector<1x128xf32>
    %13 = vector.broadcast %11 : vector<304x1xf32> to vector<304x128xf32>
    %14 = vector.broadcast %12 : vector<1x128xf32> to vector<304x128xf32>
    %15 = arith.mulf %13, %14 : vector<304x128xf32>
    %16 = arith.addf %10, %15 : vector<304x128xf32>
    %17 = vector.broadcast %2 : vector<1x128xf32> to vector<304x128xf32>
    %18 = arith.addf %16, %17 : vector<304x128xf32>
    %cst = arith.constant 0.000000e+00 : f32
    %19 = vector.broadcast %cst : f32 to vector<304x128xf32>
    %20 = arith.maximumf %18, %19 : vector<304x128xf32>
    %21 = vector.extract_strided_slice %20 {offsets = [0, 0], sizes = [304, 32], strides = [1, 1]} : vector<304x128xf32> to vector<304x32xf32>
    %c16 = arith.constant 16 : index
    %c0_7 = arith.constant 0 : index
    %22 = vector.load %arg2[%c16, %c0_7] : memref<72x128xf32, #tpu.memory_space<vmem>>, vector<32x128xf32>
    %cst_8 = arith.constant dense<0.000000e+00> : vector<304x128xf32>
    %23 = tpu.matmul %21, %22, %cst_8 {dimension_numbers = #tpu.dot_dimension_numbers<[1], [0], [0], [1], [0, 0, 1, 1], [], []>} : vector<304x32xf32>, vector<32x128xf32>, vector<304x128xf32> -> vector<304x128xf32>
    %24 = vector.broadcast %3 : vector<1x128xf32> to vector<304x128xf32>
    %25 = arith.addf %23, %24 : vector<304x128xf32>
    %cst_9 = arith.constant 0.000000e+00 : f32
    %26 = vector.broadcast %cst_9 : f32 to vector<304x128xf32>
    %27 = arith.maximumf %25, %26 : vector<304x128xf32>
    %28 = vector.extract_strided_slice %27 {offsets = [0, 0], sizes = [304, 8], strides = [1, 1]} : vector<304x128xf32> to vector<304x8xf32>
    %c48 = arith.constant 48 : index
    %c0_10 = arith.constant 0 : index
    %29 = vector.load %arg2[%c48, %c0_10] : memref<72x128xf32, #tpu.memory_space<vmem>>, vector<8x128xf32>
    %cst_11 = arith.constant dense<0.000000e+00> : vector<304x128xf32>
    %30 = tpu.matmul %28, %29, %cst_11 {dimension_numbers = #tpu.dot_dimension_numbers<[1], [0], [0], [1], [0, 0, 1, 1], [], []>} : vector<304x8xf32>, vector<8x128xf32>, vector<304x128xf32> -> vector<304x128xf32>
    %31 = vector.broadcast %4 : vector<1x128xf32> to vector<304x128xf32>
    %32 = arith.addf %30, %31 : vector<304x128xf32>
    %cst_12 = arith.constant 0.000000e+00 : f32
    %33 = vector.broadcast %cst_12 : f32 to vector<304x128xf32>
    %34 = arith.maximumf %32, %33 : vector<304x128xf32>
    %35 = vector.extract_strided_slice %34 {offsets = [0, 0], sizes = [304, 16], strides = [1, 1]} : vector<304x128xf32> to vector<304x16xf32>
    %c56 = arith.constant 56 : index
    %c0_13 = arith.constant 0 : index
    %36 = vector.load %arg2[%c56, %c0_13] : memref<72x128xf32, #tpu.memory_space<vmem>>, vector<16x128xf32>
    %cst_14 = arith.constant dense<0.000000e+00> : vector<304x128xf32>
    %37 = tpu.matmul %35, %36, %cst_14 {dimension_numbers = #tpu.dot_dimension_numbers<[1], [0], [0], [1], [0, 0, 1, 1], [], []>} : vector<304x16xf32>, vector<16x128xf32>, vector<304x128xf32> -> vector<304x128xf32>
    %38 = vector.broadcast %5 : vector<1x128xf32> to vector<304x128xf32>
    %39 = arith.addf %37, %38 : vector<304x128xf32>
    %40 = vector.extract_strided_slice %39 {offsets = [0, 0], sizes = [304, 4], strides = [1, 1]} : vector<304x128xf32> to vector<304x4xf32>
    %c0_15 = arith.constant 0 : index
    %c0_16 = arith.constant 0 : index
    %41 = vector.load %arg3[%c0_15, %c0_16] : memref<304x4xf32, #tpu.memory_space<vmem>>, vector<304x4xf32>
    tpu.vector_store %arg3[%c0_15, %c0_16], %40 {strides = array<i32>} : memref<304x4xf32, #tpu.memory_space<vmem>>, vector<304x4xf32>,
    return
  }
  func.func @transform_0(%arg0: i32) -> (i32, i32) {
    %c0_i32 = arith.constant 0 : i32
    %c0_i32_0 = arith.constant 0 : i32
    return %arg0, %c0_i32 : i32, i32
  }
  func.func @transform_1(%arg0: i32) -> (i32, i32) {
    %c0_i32 = arith.constant 0 : i32
    %c0_i32_0 = arith.constant 0 : i32
    %c0_i32_1 = arith.constant 0 : i32
    return %c0_i32, %c0_i32_0 : i32, i32
  }
  func.func @transform_2(%arg0: i32) -> (i32, i32) {
    %c0_i32 = arith.constant 0 : i32
    %c0_i32_0 = arith.constant 0 : i32
    return %arg0, %c0_i32 : i32, i32
  }
}

</mosaic_0001>

<bundles_post_ra>
// kernel: deep_grid_learner_2d.1
= control target key start
LH: loop header
LB: loop body
LE: loop exit
PB: predicated region body
PF: predicated region fallthrough
CT: control target
= control target key end

     0   :  { %v1628_v0 = vmov 0   ;;  %v1629_v4 = vmov 1   ;;  %vm594_vm0 = vcmask 261120   ;;  %vm880_vm1 = vcmask 64512   ;;  %s2412_s0 = inlined_call_operand.vmem [shape: f32[304,2], index: 0, kind: input, shape index: {}]   ;;  %s2413_s1 = inlined_call_operand.vmem [shape: f32[72,128], index: 1, kind: input, shape index: {}]   ;;  %s2414_s2 = inlined_call_operand.vmem [shape: f32[304,4], index: 2, kind: output, shape index: {}]  }
   0x1   :  { %1581 = vset.pattern.permute.xlu1 %v1628_v0  ;;  %1579 = vset.pattern.permute.xlu0 %v1628_v0  ;;  %v12_v1 = vld [vmem:[%s2412_s0 + $0x8] sm:$0xff]  ;;  %v11_v2 = vld [vmem:[%s2412_s0] sm:$0xff]  ;;  %v13_v3 = vld [vmem:[%s2412_s0 + $0x10] sm:$0xff]  ;;  %vm1167_vm2 = vcmask 130048   ;;  %vm1413_vm3 = vcmask 31744  }
   0x2   :  { %61 = vperm.xlu1 %1581, %v12_v1   ;;  %56 = vperm.xlu0 %1579, %v11_v2   ;;  %v14_v5 = vld [vmem:[%s2412_s0 + $0x18] sm:$0xff]  ;;  %v15_v6 = vld [vmem:[%s2412_s0 + $0x20] sm:$0xff]  ;;  %v17_v7 = vld [vmem:[%s2412_s0 + $0x30] sm:$0xff] }
   0x3   :  { %1583 = vset.pattern.permute.xlu2 %v1628_v0  ;;  %v16_v8 = vld [vmem:[%s2412_s0 + $0x28] sm:$0xff]  ;;  %v18_v10 = vld [vmem:[%s2412_s0 + $0x38] sm:$0xff]  ;;  %v19_v12 = vld [vmem:[%s2412_s0 + $0x40] sm:$0xff] }
   0x4   :  { %66 = vperm.xlu2 %1583, %v13_v3   ;;  %v20_v9 = vld [vmem:[%s2412_s0 + $0x48] sm:$0xff]  ;;  %v22_v11 = vld [vmem:[%s2412_s0 + $0x58] sm:$0xff]  ;;  %v25_v13 = vld [vmem:[%s2412_s0 + $0x70] sm:$0xff] }
   0x5   :  { %v21_v14 = vld [vmem:[%s2412_s0 + $0x50] sm:$0xff]  ;;  %v27_v15 = vld [vmem:[%s2412_s0 + $0x80] sm:$0xff]  ;;  %v24_v17 = vld [vmem:[%s2412_s0 + $0x68] sm:$0xff] }
   0x6   :  { %v23_v16 = vld [vmem:[%s2412_s0 + $0x60] sm:$0xff]  ;;  %v1717_v18 = vld [vmem:[%s2412_s0 + $0xf0] sm:$0xff]  ;;  %v592_v20 = vld [vmem:[%s2413_s1 + $0x28] sm:$0xff] }
   0x7   :  { %721 = vmatpush.msra.mxu0 %v592_v20  ;;  %1570 = vmatpush.msra.mxu3 %v592_v20  ;;  %v591_v21 = vld [vmem:[%s2413_s1 + $0x20] sm:$0xff]  ;;  %v26_v22 = vld [vmem:[%s2412_s0 + $0x78] sm:$0xff]  ;;  %v40_v24 = vld [vmem:[%s2412_s0 + $0xe8] sm:$0xff] }
   0x8   :  { %v590_v23 = vld [vmem:[%s2413_s1 + $0x18] sm:$0xff]  ;;  %v589_v25 = vld [vmem:[%s2413_s1 + $0x10] sm:$0xff]  ;;  %v28_v27 = vld [vmem:[%s2412_s0 + $0x88] sm:$0xff] }
   0x9   :  { %722 = vmatpush.msra.mxu0 %v591_v21  ;;  %1571 = vmatpush.msra.mxu3 %v591_v21  ;;  %v1751_v31 = vld [vmem:[%s2412_s0 + $0xa8] sm:$0xff]  ;;  %v49_v32 = vld [vmem:[%s2413_s1] sm:$0x3]  ;;  %v29_v33 = vld [vmem:[%s2412_s0 + $0x90] sm:$0xff] }
   0xa   :  { %1582 = vset.pattern.permute.xlu1 %v1629_v4  ;;  %1580 = vset.pattern.permute.xlu0 %v1629_v4  ;;  %v1762_v35 = vperm.slane %v49_v32, 0  ;;  %v1765_v37 = vperm.slane %v49_v32, 1  ;;  %v1771_v41 = vld [vmem:[%s2412_s0 + $0x110] sm:$0xff]  ;;  %v1778_v44 = vld [vmem:[%s2413_s1 + $0x8] ss:$0 sm:$0xff]  ;;  %v30_v50 = vld [vmem:[%s2412_s0 + $0x98] sm:$0xff] }
   0xb   :  { %288 = vperm.xlu1 %1582, %v12_v1   ;;  %284 = vperm.xlu0 %1580, %v11_v2   ;;  %v33_v52 = vld [vmem:[%s2412_s0 + $0xb0] sm:$0xff]  ;;  %v31_v62 = vld [vmem:[%s2412_s0 + $0xa0] sm:$0xff] }
   0xc   :  { %1584 = vset.pattern.permute.xlu2 %v1629_v4  ;;  %723 = vmatpush.msra.mxu0 %v590_v23 }
   0xd   :  { %292 = vperm.xlu2 %1584, %v13_v3   ;;  %1572 = vmatpush.msra.mxu3 %v590_v23 }
   0xe   :  { %724 = vmatpush.msra.mxu0 %v589_v25 }
   0xf   :  { %1573 = vmatpush.msra.mxu3 %v589_v25 }
  0x13   :  { %1585 = vset.pattern.permute.xlu1 %v1628_v0  ;;  %1586 = vset.pattern.permute.xlu0 %v1628_v0 }
  0x14   :  { %71 = vperm.xlu1 %1585, %v14_v5   ;;  %76 = vperm.xlu0 %1586, %v15_v6  }
  0x15   :  { %296 = vperm.xlu2 %1584, %v14_v5  }
  0x1c   :  { %1587 = vset.pattern.permute.xlu1 %v1629_v4  ;;  %1589 = vset.pattern.permute.xlu0 %v1629_v4 }
  0x1d   :  { %300 = vperm.xlu1 %1587, %v15_v6   ;;  %308 = vperm.xlu0 %1589, %v17_v7  }
  0x1e   :  { %1588 = vset.pattern.permute.xlu2 %v1628_v0 }
  0x1f   :  { %81 = vperm.xlu2 %1588, %v16_v8  }
  0x25   :  { %304 = vperm.xlu1 %1587, %v16_v8   ;;  %1592 = vset.pattern.permute.xlu0 %v1628_v0 }
  0x26   :  { %101 = vperm.xlu0 %1592, %v20_v9  }
  0x27   :  { %86 = vperm.xlu2 %1588, %v17_v7  }
  0x2d   :  { %1590 = vset.pattern.permute.xlu1 %v1628_v0 }
  0x2e   :  { %91 = vperm.xlu1 %1590, %v18_v10   ;;  %1595 = vset.pattern.permute.xlu0 %v1629_v4 }
  0x2f   :  { %1591 = vset.pattern.permute.xlu2 %v1629_v4  ;;  %328 = vperm.xlu0 %1595, %v22_v11  }
  0x30   :  { %312 = vperm.xlu2 %1591, %v18_v10   ;;  %v42_v10 = vld [vmem:[%s2412_s0 + $0xf8] sm:$0xff] }
  0x36   :  { %96 = vperm.xlu1 %1590, %v19_v12  }
  0x37   :  { %1598 = vset.pattern.permute.xlu0 %v1628_v0 }
  0x38   :  { %316 = vperm.xlu2 %1591, %v19_v12   ;;  %126 = vperm.xlu0 %1598, %v25_v13  }
  0x3e   :  { %1593 = vset.pattern.permute.xlu1 %v1629_v4 }
  0x3f   :  { %320 = vperm.xlu1 %1593, %v20_v9  }
  0x40   :  { %1594 = vset.pattern.permute.xlu2 %v1628_v0  ;;  %1601 = vset.pattern.permute.xlu0 %v1629_v4 }
  0x41   :  { %106 = vperm.xlu2 %1594, %v21_v14   ;;  %348 = vperm.xlu0 %1601, %v27_v15  }
  0x47   :  { %324 = vperm.xlu1 %1593, %v21_v14  }
  0x49   :  { %111 = vperm.xlu2 %1594, %v22_v11   ;;  %404 = vperm.xlu0 %1601, %v1717_v18  }
  0x4f   :  { %1596 = vset.pattern.permute.xlu1 %v1628_v0 }
  0x50   :  { %116 = vperm.xlu1 %1596, %v23_v16  }
  0x51   :  { %1597 = vset.pattern.permute.xlu2 %v1629_v4  ;;  %1606 = vset.pattern.permute.xlu0 %v1628_v0 }
  0x52   :  { %332 = vperm.xlu2 %1597, %v23_v16   ;;  %201 = vperm.xlu0 %1606, %v40_v24  }
  0x58   :  { %121 = vperm.xlu1 %1596, %v24_v17  }
  0x5a   :  { %336 = vperm.xlu2 %1597, %v24_v17   ;;  %161 = vperm.xlu0 %1606, %v1751_v31  }
  0x5e   :  { %v1720_v19 = vpop.permute.xlu2 %66 }
  0x5f   :  { %v247_v53 = vmul.f32 %v1762_v35, %v1720_v19 }
  0x60   :  { %1599 = vset.pattern.permute.xlu1 %v1629_v4 }
  0x61   :  { %340 = vperm.xlu1 %1599, %v25_v13  }
  0x62   :  { %1600 = vset.pattern.permute.xlu2 %v1628_v0  ;;  %226 = vperm.xlu0 %1606, %v1771_v41  }
  0x63   :  { %131 = vperm.xlu2 %1600, %v26_v22  }
  0x67   :  { %v293_v26 = vpop.permute.xlu2 %292 }
  0x68   :  { %v438_v54 = vmul.f32 %v1765_v37, %v293_v26 }
  0x69   :  { %344 = vperm.xlu1 %1599, %v26_v22   ;;  %v43_v22 = vld [vmem:[%s2412_s0 + $0x100] sm:$0xff] }
  0x6a   :  { %1613 = vset.pattern.permute.xlu0 %v1629_v4  ;;  %v476_v57 = vadd.f32 %v438_v54, %v247_v53 }
  0x6b   :  { %136 = vperm.xlu2 %1600, %v27_v15   ;;  %372 = vperm.xlu0 %1613, %v33_v52  }
  0x6c   :  { %v515_v61 = vadd.f32 %v1778_v44, %v476_v57 }
  0x6e   :  { %v553_v3 = vmax.f32 %v515_v61, 0.0 }
  0x6f   :  { %v297_v28 = vpop.permute.xlu2 %296 }
  0x70   :  { %v439_v63 = vmul.f32 %v1765_v37, %v297_v28 }
  0x71   :  { %1602 = vset.pattern.permute.xlu1 %v1628_v0 }
  0x72   :  { %141 = vperm.xlu1 %1602, %v28_v27  }
  0x73   :  { %1603 = vset.pattern.permute.xlu2 %v1629_v4 }
  0x74   :  { %v62_v29 = vpop.permute.xlu1 %61  ;;  %v57_v30 = vpop.permute.xlu0 %56  ;;  %352 = vperm.xlu2 %1603, %v28_v27   ;;  %v1840_v27 = vld [vmem:[%s2412_s0 + $0x118] sm:$0xff] }
  0x75   :  { %v245_v36 = vmul.f32 %v1762_v35, %v57_v30  ;;  %v246_v46 = vmul.f32 %v1762_v35, %v62_v29  ;;  %424 = vperm.xlu0 %1613, %v1840_v27  }
  0x79   :  { %v1760_v34 = vpop.permute.xlu2 %81 }
  0x7a   :  { %146 = vperm.xlu1 %1602, %v29_v33   ;;  %v250_v17 = vmul.f32 %v1762_v35, %v1760_v34 }
  0x7c   :  { %356 = vperm.xlu2 %1603, %v29_v33  }
  0x7d   :  { %v289_v38 = vpop.permute.xlu1 %288  ;;  %v285_v39 = vpop.permute.xlu0 %284  ;;  %1618 = vset.pattern.permute.xlu0 %v1628_v0 }
  0x7e   :  { %v436_v40 = vmul.f32 %v1765_v37, %v285_v39  ;;  %v437_v42 = vmul.f32 %v1765_v37, %v289_v38 }
  0x80   :  { %v474_v43 = vadd.f32 %v436_v40, %v245_v36  ;;  %v475_v48 = vadd.f32 %v437_v42, %v246_v46  ;;  %v44_v36 = vld [vmem:[%s2412_s0 + $0x108] sm:$0xff] }
  0x81   :  { %v1780_v45 = vpop.permute.xlu2 %86 }
  0x82   :  { %1604 = vset.pattern.permute.xlu1 %v1629_v4  ;;  %v513_v47 = vadd.f32 %v1778_v44, %v474_v43  ;;  %v514_v55 = vadd.f32 %v1778_v44, %v475_v48  ;;  %v251_v23 = vmul.f32 %v1762_v35, %v1780_v45 }
  0x83   :  { %400 = vperm.xlu1 %1604, %v40_v24  }
  0x84   :  { %v551_v49 = vmax.f32 %v513_v47, 0.0  ;;  %1605 = vset.pattern.permute.xlu2 %v1628_v0  ;;  %v552_v58 = vmax.f32 %v514_v55, 0.0  ;;  %v34_v47 = vld [vmem:[%s2412_s0 + $0xb8] sm:$0xff]  ;;  %v1874_v55 = vld [vmem:[%s2412_s0 + $0xd0] sm:$0xff] }
  0x85   :  { %151 = vperm.xlu2 %1605, %v30_v50   ;;  %186 = vperm.xlu0 %1618, %v1874_v55  }
  0x86   :  { %v72_v51 = vpop.permute.xlu1 %71  ;;  %1456 = vmatmul.msk.f32.vlgmr.msra.gmra.mxu0 %vm594_vm0, %v551_v49  ;;  %v77_v5 = vpop.permute.xlu0 %76 }
  0x87   :  { %v248_v60 = vmul.f32 %v1762_v35, %v72_v51  ;;  %v249_v7 = vmul.f32 %v1762_v35, %v77_v5 }
  0x89   :  { %v477_v2 = vadd.f32 %v439_v63, %v248_v60 }
  0x8a   :  { %v313_v56 = vpop.permute.xlu2 %312 }
  0x8b   :  { %360 = vperm.xlu1 %1604, %v30_v50   ;;  %v516_v9 = vadd.f32 %v1778_v44, %v477_v2 }
  0x8d   :  { %206 = vperm.xlu2 %1605, %v1717_v18   ;;  %v554_v13 = vmax.f32 %v516_v9, 0.0  ;;  %1621 = vset.pattern.permute.xlu0 %v1629_v4 }
  0x8e   :  { %1457 = vmatmul.msk.f32.gmra.mxu0 %vm594_vm0, %v552_v58 }
  0x8f   :  { %v301_v59 = vpop.permute.xlu1 %300  ;;  %v309_v21 = vpop.permute.xlu0 %308 }
  0x90   :  { %v440_v8 = vmul.f32 %v1765_v37, %v301_v59  ;;  %v442_v24 = vmul.f32 %v1765_v37, %v309_v21 }
  0x92   :  { %v1806_v1 = vpop.permute.xlu2 %316  ;;  %v478_v12 = vadd.f32 %v440_v8, %v249_v7  ;;  %v480_v28 = vadd.f32 %v442_v24, %v251_v23 }
  0x93   :  { %1607 = vset.pattern.permute.xlu1 %v1628_v0  ;;  %v444_v46 = vmul.f32 %v1765_v37, %v1806_v1 }
  0x94   :  { %156 = vperm.xlu1 %1607, %v31_v62   ;;  %v517_v16 = vadd.f32 %v1778_v44, %v478_v12  ;;  %v519_v33 = vadd.f32 %v1778_v44, %v480_v28 }
  0x95   :  { %1608 = vset.pattern.permute.xlu2 %v1629_v4 }
  0x96   :  { %1458 = vmatmul.msk.f32.gmra.mxu0 %vm594_vm0, %v553_v3  ;;  %364 = vperm.xlu2 %1608, %v31_v62   ;;  %v555_v20 = vmax.f32 %v517_v16, 0.0  ;;  %v557_v39 = vmax.f32 %v519_v33, 0.0  ;;  %v35_v62 = vld [vmem:[%s2412_s0 + $0xc0] sm:$0xff] }
  0x97   :  { %v305_v6 = vpop.permute.xlu1 %304 }
  0x98   :  { %v441_v14 = vmul.f32 %v1765_v37, %v305_v6  ;;  %v102_v51 = vpop.permute.xlu0 %101 }
  0x9a   :  { %v479_v19 = vadd.f32 %v441_v14, %v250_v17  ;;  %v36_v14 = vld [vmem:[%s2412_s0 + $0xc8] sm:$0xff] }
  0x9b   :  { %v1817_v11 = vpop.permute.xlu2 %106 }
  0x9c   :  { %211 = vperm.xlu1 %1607, %v42_v10   ;;  %v518_v26 = vadd.f32 %v1778_v44, %v479_v19  ;;  %v255_v63 = vmul.f32 %v1762_v35, %v1817_v11 }
  0x9e   :  { %1459 = vmatmul.msk.f32.gmra.mxu0 %vm594_vm0, %v554_v13  ;;  %408 = vperm.xlu2 %1608, %v42_v10   ;;  %v556_v29 = vmax.f32 %v518_v26, 0.0 }
  0xa0   :  { %v92_v15 = vpop.permute.xlu1 %91 }
  0xa1   :  { %v252_v32 = vmul.f32 %v1762_v35, %v92_v15  ;;  %v329_v5 = vpop.permute.xlu0 %328 }
  0xa2   :  { %v447_v8 = vmul.f32 %v1765_v37, %v329_v5 }
  0xa3   :  { %v1824_v18 = vpop.permute.xlu2 %111 }
  0xa4   :  { %1609 = vset.pattern.permute.xlu1 %v1629_v4  ;;  %v256_v7 = vmul.f32 %v1762_v35, %v1824_v18 }
  0xa5   :  { %368 = vperm.xlu1 %1609, %v1751_v31   ;;  %v443_v31 = vmul.f32 %v1765_v37, %v313_v56 }
  0xa6   :  { %1460 = vmatmul.msk.f32.gmra.mxu0 %vm594_vm0, %v555_v20  ;;  %1610 = vset.pattern.permute.xlu2 %v1628_v0  ;;  %v485_v11 = vadd.f32 %v447_v8, %v256_v7  ;;  %v1971_v8 = vld [vmem:[%s2413_s1 + $0x9] ss:$0 sm:$0xff] }
  0xa7   :  { %216 = vperm.xlu2 %1610, %v43_v22   ;;  %v481_v38 = vadd.f32 %v443_v31, %v252_v32  ;;  %v878_v31 = vld [vmem:[%s2413_s1 + $0x30] sm:$0xff] }
  0xa8   :  { %v97_v25 = vpop.permute.xlu1 %96  ;;  %v524_v18 = vadd.f32 %v1778_v44, %v485_v11  ;;  %1010 = vmatpush.msra.mxu1 %v878_v31  ;;  %1574 = vmatpush.msrb.mxu3 %v878_v31 }
  0xa9   :  { %v253_v42 = vmul.f32 %v1762_v35, %v97_v25  ;;  %v520_v43 = vadd.f32 %v1778_v44, %v481_v38 }
  0xaa   :  { %v127_v13 = vpop.permute.xlu0 %126  ;;  %v562_v21 = vmax.f32 %v524_v18, 0.0 }
  0xab   :  { %v482_v48 = vadd.f32 %v444_v46, %v253_v42  ;;  %v558_v49 = vmax.f32 %v520_v43, 0.0 }
  0xac   :  { %v1843_v30 = vpop.permute.xlu2 %332 }
  0xad   :  { %412 = vperm.xlu1 %1609, %v43_v22   ;;  %v521_v54 = vadd.f32 %v1778_v44, %v482_v48  ;;  %v448_v16 = vmul.f32 %v1765_v37, %v1843_v30  ;;  %v47_v22 = vld [vmem:[%s2412_s0 + $0x120] sm:$0xff] }
  0xae   :  { %1461 = vmatmul.msk.f32.gmra.mxu0 %vm594_vm0, %v556_v29 }
  0xaf   :  { %166 = vperm.xlu2 %1610, %v33_v52   ;;  %v254_v52 = vmul.f32 %v1762_v35, %v102_v51  ;;  %v559_v58 = vmax.f32 %v521_v54, 0.0 }
  0xb1   :  { %v321_v34 = vpop.permute.xlu1 %320 }
  0xb2   :  { %v445_v53 = vmul.f32 %v1765_v37, %v321_v34  ;;  %v259_v34 = vmul.f32 %v1762_v35, %v127_v13 }
  0xb3   :  { %v349_v23 = vpop.permute.xlu0 %348 }
  0xb4   :  { %v1853_v40 = vpop.permute.xlu2 %336  ;;  %v483_v57 = vadd.f32 %v445_v53, %v254_v52 }
  0xb5   :  { %1611 = vset.pattern.permute.xlu1 %v1628_v0 }
  0xb6   :  { %221 = vperm.xlu1 %1611, %v44_v36   ;;  %1462 = vmatmul.msk.f32.gmra.mxu0 %vm594_vm0, %v557_v39  ;;  %v522_v61 = vadd.f32 %v1778_v44, %v483_v57  ;;  %v48_v39 = vld [vmem:[%s2412_s0 + $0x128] sm:$0xff]  ;;  %v452_v57 = vmul.f32 %v1765_v37, %v349_v23 }
  0xb7   :  { %1612 = vset.pattern.permute.xlu2 %v1629_v4 }
  0xb8   :  { %416 = vperm.xlu2 %1612, %v44_v36   ;;  %v560_v3 = vmax.f32 %v522_v61, 0.0 }
  0xb9   :  { %v325_v45 = vpop.permute.xlu1 %324 }
  0xba   :  { %v446_v60 = vmul.f32 %v1765_v37, %v325_v45 }
  0xbb   :  { %v405_v32 = vpop.permute.xlu0 %404 }
  0xbc   :  { %v484_v2 = vadd.f32 %v446_v60, %v255_v63 }
  0xbd   :  { %v1865_v50 = vpop.permute.xlu2 %131 }
  0xbe   :  { %171 = vperm.xlu1 %1611, %v34_v47   ;;  %1463 = vmatmul.msk.f32.gmra.mxu0 %vm594_vm0, %v558_v49  ;;  %v523_v9 = vadd.f32 %v1778_v44, %v484_v2  ;;  %v260_v49 = vmul.f32 %v1762_v35, %v1865_v50  ;;  %v39_v50 = vld [vmem:[%s2412_s0 + $0xe0] sm:$0xff] }
  0xc0   :  { %376 = vperm.xlu2 %1612, %v34_v47   ;;  %v561_v12 = vmax.f32 %v523_v9, 0.0 }
  0xc2   :  { %v117_v56 = vpop.permute.xlu1 %116 }
  0xc3   :  { %v257_v17 = vmul.f32 %v1762_v35, %v117_v56 }
  0xc4   :  { %v202_v48 = vpop.permute.xlu0 %201 }
  0xc5   :  { %v1877_v59 = vpop.permute.xlu2 %136  ;;  %v486_v20 = vadd.f32 %v448_v16, %v257_v17  ;;  %v274_v52 = vmul.f32 %v1762_v35, %v202_v48 }
  0xc6   :  { %1614 = vset.pattern.permute.xlu1 %v1629_v4  ;;  %1464 = vmatmul.msk.f32.gmra.mxu0 %vm594_vm0, %v559_v58  ;;  %v261_v56 = vmul.f32 %v1762_v35, %v1877_v59  ;;  %v466_v58 = vmul.f32 %v1765_v37, %v405_v32 }
  0xc7   :  { %420 = vperm.xlu1 %1614, %v1771_v41   ;;  %v1894_v41 = vld [vmem:[%s2412_s0 + $0xd8] sm:$0xff]  ;;  %v525_v26 = vadd.f32 %v1778_v44, %v486_v20 }
  0xc8   :  { %1615 = vset.pattern.permute.xlu2 %v1628_v0  ;;  %392 = vperm.xlu0 %1621, %v1894_v41   ;;  %v490_v59 = vadd.f32 %v452_v57, %v261_v56 }
  0xc9   :  { %176 = vperm.xlu2 %1615, %v35_v62   ;;  %v563_v30 = vmax.f32 %v525_v26, 0.0 }
  0xca   :  { %v122_v1 = vpop.permute.xlu1 %121 }
  0xcb   :  { %v258_v25 = vmul.f32 %v1762_v35, %v122_v1 }
  0xcc   :  { %v162_v32 = vpop.permute.xlu0 %161 }
  0xce   :  { %1465 = vmatmul.msk.f32.gmra.mxu0 %vm594_vm0, %v560_v3  ;;  %v1898_v6 = vpop.permute.xlu2 %352 }
  0xcf   :  { %380 = vperm.xlu1 %1614, %v35_v62   ;;  %v453_v7 = vmul.f32 %v1765_v37, %v1898_v6 }
  0xd1   :  { %231 = vperm.xlu2 %1615, %v1840_v27   ;;  %v449_v27 = vmul.f32 %v1765_v37, %v1853_v40 }
  0xd3   :  { %v341_v10 = vpop.permute.xlu1 %340  ;;  %v487_v28 = vadd.f32 %v449_v27, %v258_v25 }
  0xd4   :  { %v450_v36 = vmul.f32 %v1765_v37, %v341_v10 }
  0xd5   :  { %v526_v38 = vadd.f32 %v1778_v44, %v487_v28 }
  0xd6   :  { %1466 = vmatmul.msk.f32.gmra.mxu0 %vm594_vm0, %v561_v12  ;;  %v1909_v15 = vpop.permute.xlu2 %356  ;;  %v488_v40 = vadd.f32 %v450_v36, %v259_v34 }
  0xd7   :  { %1616 = vset.pattern.permute.xlu1 %v1628_v0  ;;  %v564_v43 = vmax.f32 %v526_v38, 0.0  ;;  %v454_v20 = vmul.f32 %v1765_v37, %v1909_v15 }
  0xd8   :  { %181 = vperm.xlu1 %1616, %v36_v14   ;;  %v527_v46 = vadd.f32 %v1778_v44, %v488_v40 }
  0xd9   :  { %1617 = vset.pattern.permute.xlu2 %v1629_v4 }
  0xda   :  { %384 = vperm.xlu2 %1617, %v36_v14   ;;  %v565_v53 = vmax.f32 %v527_v46, 0.0 }
  0xdb   :  { %v345_v19 = vpop.permute.xlu1 %344 }
  0xdc   :  { %v451_v45 = vmul.f32 %v1765_v37, %v345_v19 }
  0xde   :  { %1467 = vmatmul.msk.f32.gmra.mxu0 %vm594_vm0, %v562_v21  ;;  %v489_v51 = vadd.f32 %v451_v45, %v260_v49 }
  0xdf   :  { %v1921_v24 = vpop.permute.xlu2 %151 }
  0xe0   :  { %236 = vperm.xlu1 %1616, %v47_v22   ;;  %v528_v62 = vadd.f32 %v1778_v44, %v489_v51  ;;  %v264_v34 = vmul.f32 %v1762_v35, %v1921_v24 }
  0xe2   :  { %428 = vperm.xlu2 %1617, %v47_v22   ;;  %v566_v2 = vmax.f32 %v528_v62, 0.0 }
  0xe4   :  { %v142_v29 = vpop.permute.xlu1 %141 }
  0xe6   :  { %1468 = vmatmul.msk.f32.gmra.mxu0 %vm594_vm0, %v563_v30 }
  0xe7   :  { %v207_v33 = vpop.permute.xlu2 %206 }
  0xe8   :  { %1619 = vset.pattern.permute.xlu1 %v1629_v4  ;;  %v275_v61 = vmul.f32 %v1762_v35, %v207_v33 }
  0xe9   :  { %388 = vperm.xlu1 %1619, %v1874_v55  }
  0xea   :  { %1620 = vset.pattern.permute.xlu2 %v1628_v0 }
  0xeb   :  { %241 = vperm.xlu2 %1620, %v48_v39  }
  0xec   :  { %v147_v42 = vpop.permute.xlu1 %146 }
  0xed   :  { %v263_v18 = vmul.f32 %v1762_v35, %v147_v42 }
  0xee   :  { %1469 = vmatmul.msk.f32.gmra.mxu0 %vm594_vm0, %v564_v43 }
  0xef   :  { %v492_v23 = vadd.f32 %v454_v20, %v263_v18 }
  0xf0   :  { %v1943_v47 = vpop.permute.xlu2 %364 }
  0xf1   :  { %432 = vperm.xlu1 %1619, %v48_v39   ;;  %v531_v15 = vadd.f32 %v1778_v44, %v492_v23  ;;  %v456_v49 = vmul.f32 %v1765_v37, %v1943_v47 }
  0xf3   :  { %191 = vperm.xlu2 %1620, %v1894_v41   ;;  %v504_v41 = vadd.f32 %v466_v58, %v275_v61  ;;  %v569_v42 = vmax.f32 %v531_v15, 0.0  ;;  %v266_v58 = vmul.f32 %v1762_v35, %v162_v32 }
  0xf5   :  { %v401_v54 = vpop.permute.xlu1 %400  ;;  %v543_v9 = vadd.f32 %v1778_v44, %v504_v41 }
  0xf6   :  { %v465_v55 = vmul.f32 %v1765_v37, %v401_v54  ;;  %1470 = vmatmul.msk.f32.gmra.mxu0 %vm594_vm0, %v565_v53 }
  0xf7   :  { %v581_v16 = vmax.f32 %v543_v9, 0.0 }
  0xf8   :  { %v503_v60 = vadd.f32 %v465_v55, %v274_v52  ;;  %v409_v63 = vpop.permute.xlu2 %408  ;;  %v227_v52 = vpop.permute.xlu0 %226 }
  0xf9   :  { %1622 = vset.pattern.permute.xlu1 %v1628_v0  ;;  %v262_v0 = vmul.f32 %v1762_v35, %v142_v29  ;;  %v467_v29 = vmul.f32 %v1765_v37, %v409_v63 }
  0xfa   :  { %196 = vperm.xlu1 %1622, %v39_v50   ;;  %v542_v1 = vadd.f32 %v1778_v44, %v503_v60 }
  0xfb   :  { %1623 = vset.pattern.permute.xlu2 %v1629_v4  ;;  %v529_v4 = vadd.f32 %v1778_v44, %v490_v59  ;;  %v491_v12 = vadd.f32 %v453_v7, %v262_v0 }
  0xfc   :  { %v580_v3 = vmax.f32 %v542_v1, 0.0  ;;  %396 = vperm.xlu2 %1623, %v39_v50  }
  0xfd   :  { %v361_v5 = vpop.permute.xlu1 %360  ;;  %v567_v14 = vmax.f32 %v529_v4, 0.0  ;;  %v530_v19 = vadd.f32 %v1778_v44, %v491_v12 }
  0xfe   :  { %1471 = vmatmul.msk.f32.gmra.mxu0 %vm594_vm0, %v566_v2  ;;  %1485 = vmatmul.msk.f32.vlgmr.msra.gmra.mxu3 %vm594_vm0, %v580_v3  ;;  %v455_v31 = vmul.f32 %v1765_v37, %v361_v5 }
  0xff   :  { %v568_v26 = vmax.f32 %v530_v19, 0.0 }
 0x100   :  { %v493_v39 = vadd.f32 %v455_v31, %v264_v34  ;;  %v373_v7 = vpop.permute.xlu0 %372 }
 0x101   :  { %v217_v10 = vpop.permute.xlu2 %216 }
 0x102   :  { %v532_v51 = vadd.f32 %v1778_v44, %v493_v39  ;;  %v277_v47 = vmul.f32 %v1762_v35, %v217_v10  ;;  %v279_v39 = vmul.f32 %v1762_v35, %v227_v52 }
 0x103   :  { %v726_v11 = vpop.f32.mrf.mxu0 }
 0x104   :  { %v727_v13 = vadd.f32 %v1971_v8, %v726_v11  ;;  %v570_v56 = vmax.f32 %v532_v51, 0.0  ;;  %v458_v11 = vmul.f32 %v1765_v37, %v373_v7 }
 0x106   :  { %v840_v6 = vmax.f32 %v727_v13, 0.0  ;;  %v157_v17 = vpop.permute.xlu1 %156  ;;  %1472 = vmatmul.msk.f32.gmra.mxu0 %vm594_vm0, %v567_v14  ;;  %1486 = vmatmul.msk.f32.gmra.mxu3 %vm594_vm0, %v581_v16 }
 0x107   :  { %v265_v24 = vmul.f32 %v1762_v35, %v157_v17 }
 0x108   :  { %1494 = vmatmul.msk.f32.vlgmr.msra.gmra.mxu1 %vm880_vm1, %v840_v6  ;;  %v425_v34 = vpop.permute.xlu0 %424 }
 0x109   :  { %v167_v21 = vpop.permute.xlu2 %166  ;;  %v494_v54 = vadd.f32 %v456_v49, %v265_v24 }
 0x10a   :  { %v267_v10 = vmul.f32 %v1762_v35, %v167_v21 }
 0x10b   :  { %v729_v22 = vpop.f32.mrf.mxu0  ;;  %v533_v63 = vadd.f32 %v1778_v44, %v494_v54 }
 0x10c   :  { %v730_v25 = vadd.f32 %v1971_v8, %v729_v22  ;;  %v496_v18 = vadd.f32 %v458_v11, %v267_v10 }
 0x10d   :  { %v571_v3 = vmax.f32 %v533_v63, 0.0 }
 0x10e   :  { %v841_v27 = vmax.f32 %v730_v25, 0.0  ;;  %v212_v28 = vpop.permute.xlu1 %211  ;;  %1473 = vmatmul.msk.f32.gmra.mxu0 %vm594_vm0, %v568_v26  ;;  %v535_v26 = vadd.f32 %v1778_v44, %v496_v18 }
 0x10f   :  { %v276_v30 = vmul.f32 %v1762_v35, %v212_v28 }
 0x110   :  { %1495 = vmatmul.msk.f32.gmra.mxu1 %vm880_vm1, %v841_v27  ;;  %v573_v32 = vmax.f32 %v535_v26, 0.0  ;;  %v187_v11 = vpop.permute.xlu0 %186 }
 0x111   :  { %v505_v33 = vadd.f32 %v467_v29, %v276_v30 }
 0x112   :  { %v417_v43 = vpop.permute.xlu2 %416 }
 0x113   :  { %v732_v36 = vpop.f32.mrf.mxu0  ;;  %v544_v38 = vadd.f32 %v1778_v44, %v505_v33  ;;  %v469_v9 = vmul.f32 %v1765_v37, %v417_v43  ;;  %v471_v43 = vmul.f32 %v1765_v37, %v425_v34 }
 0x114   :  { %v733_v40 = vadd.f32 %v1971_v8, %v732_v36 }
 0x115   :  { %v582_v45 = vmax.f32 %v544_v38, 0.0 }
 0x116   :  { %v842_v46 = vmax.f32 %v733_v40, 0.0  ;;  %1474 = vmatmul.msk.f32.gmra.mxu0 %vm594_vm0, %v569_v42 }
 0x117   :  { %v369_v48 = vpop.permute.xlu1 %368  ;;  %1487 = vmatmul.msk.f32.gmra.mxu3 %vm594_vm0, %v582_v45 }
 0x118   :  { %1496 = vmatmul.msk.f32.gmra.mxu1 %vm880_vm1, %v842_v46  ;;  %v457_v61 = vmul.f32 %v1765_v37, %v369_v48 }
 0x11a   :  { %v377_v50 = vpop.permute.xlu2 %376  ;;  %v495_v41 = vadd.f32 %v457_v61, %v266_v58 }
 0x11b   :  { %v735_v53 = vpop.f32.mrf.mxu0  ;;  %v459_v28 = vmul.f32 %v1765_v37, %v377_v50 }
 0x11c   :  { %v736_v55 = vadd.f32 %v1971_v8, %v735_v53  ;;  %v534_v13 = vadd.f32 %v1778_v44, %v495_v41 }
 0x11e   :  { %v843_v57 = vmax.f32 %v736_v55, 0.0  ;;  %1475 = vmatmul.msk.f32.gmra.mxu0 %vm594_vm0, %v570_v56  ;;  %v572_v20 = vmax.f32 %v534_v13, 0.0 }
 0x11f   :  { %v413_v60 = vpop.permute.xlu1 %412 }
 0x120   :  { %v468_v62 = vmul.f32 %v1765_v37, %v413_v60  ;;  %1497 = vmatmul.msk.f32.gmra.mxu1 %vm880_vm1, %v843_v57 }
 0x122   :  { %v506_v1 = vadd.f32 %v468_v62, %v277_v47 }
 0x123   :  { %v738_v59 = vpop.f32.mrf.mxu0  ;;  %v177_v14 = vpop.permute.xlu2 %176 }
 0x124   :  { %v739_v2 = vadd.f32 %v1971_v8, %v738_v59  ;;  %v545_v5 = vadd.f32 %v1778_v44, %v506_v1  ;;  %v269_v56 = vmul.f32 %v1762_v35, %v177_v14 }
 0x126   :  { %v844_v0 = vmax.f32 %v739_v2, 0.0  ;;  %1476 = vmatmul.msk.f32.gmra.mxu0 %vm594_vm0, %v571_v3  ;;  %v583_v4 = vmax.f32 %v545_v5, 0.0 }
 0x128   :  { %v222_v12 = vpop.permute.xlu1 %221  ;;  %1488 = vmatmul.msk.f32.gmra.mxu3 %vm594_vm0, %v583_v4  ;;  %1498 = vmatmul.msk.f32.gmra.mxu1 %vm880_vm1, %v844_v0 }
 0x129   :  { %v278_v16 = vmul.f32 %v1762_v35, %v222_v12 }
 0x12b   :  { %v507_v6 = vadd.f32 %v469_v9, %v278_v16  ;;  %v741_v17 = vpop.f32.mrf.mxu0  ;;  %v232_v29 = vpop.permute.xlu2 %231 }
 0x12c   :  { %v742_v19 = vadd.f32 %v1971_v8, %v741_v17  ;;  %v280_v48 = vmul.f32 %v1762_v35, %v232_v29 }
 0x12d   :  { %v546_v21 = vadd.f32 %v1778_v44, %v507_v6 }
 0x12e   :  { %v845_v22 = vmax.f32 %v742_v19, 0.0  ;;  %1477 = vmatmul.msk.f32.gmra.mxu0 %vm594_vm0, %v572_v20  ;;  %v509_v54 = vadd.f32 %v471_v43, %v280_v48 }
 0x12f   :  { %v584_v23 = vmax.f32 %v546_v21, 0.0 }
 0x130   :  { %v172_v25 = vpop.permute.xlu1 %171  ;;  %1499 = vmatmul.msk.f32.gmra.mxu1 %vm880_vm1, %v845_v22  ;;  %v548_v47 = vadd.f32 %v1778_v44, %v509_v54  ;;  %v271_v22 = vmul.f32 %v1762_v35, %v187_v11 }
 0x131   :  { %v268_v27 = vmul.f32 %v1762_v35, %v172_v25  ;;  %1489 = vmatmul.msk.f32.gmra.mxu3 %vm594_vm0, %v584_v23 }
 0x132   :  { %v586_v59 = vmax.f32 %v548_v47, 0.0 }
 0x133   :  { %v744_v30 = vpop.f32.mrf.mxu0  ;;  %v497_v31 = vadd.f32 %v459_v28, %v268_v27 }
 0x134   :  { %v745_v15 = vadd.f32 %v1971_v8, %v744_v30  ;;  %v385_v24 = vpop.permute.xlu2 %384 }
 0x135   :  { %v536_v36 = vadd.f32 %v1778_v44, %v497_v31  ;;  %v461_v41 = vmul.f32 %v1765_v37, %v385_v24 }
 0x136   :  { %v846_v33 = vmax.f32 %v745_v15, 0.0  ;;  %1478 = vmatmul.msk.f32.gmra.mxu0 %vm594_vm0, %v573_v32 }
 0x137   :  { %v574_v49 = vmax.f32 %v536_v36, 0.0 }
 0x138   :  { %1500 = vmatmul.msk.f32.gmra.mxu1 %vm880_vm1, %v846_v33 }
 0x139   :  { %v421_v38 = vpop.permute.xlu1 %420 }
 0x13a   :  { %v470_v40 = vmul.f32 %v1765_v37, %v421_v38  ;;  %v393_v25 = vpop.permute.xlu0 %392 }
 0x13b   :  { %v747_v42 = vpop.f32.mrf.mxu0  ;;  %v463_v32 = vmul.f32 %v1765_v37, %v393_v25 }
 0x13c   :  { %v508_v45 = vadd.f32 %v470_v40, %v279_v39  ;;  %v748_v46 = vadd.f32 %v1971_v8, %v747_v42  ;;  %v429_v63 = vpop.permute.xlu2 %428 }
 0x13d   :  { %v472_v14 = vmul.f32 %v1765_v37, %v429_v63 }
 0x13e   :  { %v847_v51 = vmax.f32 %v748_v46, 0.0  ;;  %1479 = vmatmul.msk.f32.gmra.mxu0 %vm594_vm0, %v574_v49  ;;  %v547_v53 = vadd.f32 %v1778_v44, %v508_v45  ;;  %v1165_v49 = vld [vmem:[%s2413_s1 + $0x40] sm:$0xff] }
 0x13f   :  { %1296 = vmatpush.msra.mxu2 %v1165_v49  ;;  %1575 = vmatpush.msra.mxu3 %v1165_v49 }
 0x140   :  { %1501 = vmatmul.msk.f32.gmra.mxu1 %vm880_vm1, %v847_v51  ;;  %v585_v52 = vmax.f32 %v547_v53, 0.0  ;;  %v1164_v53 = vld [vmem:[%s2413_s1 + $0x38] sm:$0xff] }
 0x141   :  { %v381_v55 = vpop.permute.xlu1 %380  ;;  %1297 = vmatpush.msra.mxu2 %v1164_v53  ;;  %1576 = vmatpush.msra.mxu3 %v1164_v53 }
 0x142   :  { %v460_v57 = vmul.f32 %v1765_v37, %v381_v55  ;;  %1490 = vmatmul.msk.f32.gmra.mxu3 %vm594_vm0, %v585_v52 }
 0x143   :  { %v750_v50 = vpop.f32.mrf.mxu0 }
 0x144   :  { %v498_v58 = vadd.f32 %v460_v57, %v269_v56  ;;  %v751_v60 = vadd.f32 %v1971_v8, %v750_v50 }
 0x145   :  { %v242_v10 = vpop.permute.xlu2 %241 }
 0x146   :  { %v537_v61 = vadd.f32 %v1778_v44, %v498_v58  ;;  %v848_v62 = vmax.f32 %v751_v60, 0.0  ;;  %v282_v40 = vmul.f32 %v1762_v35, %v242_v10 }
 0x148   :  { %v575_v1 = vmax.f32 %v537_v61, 0.0  ;;  %1502 = vmatmul.msk.f32.gmra.mxu1 %vm880_vm1, %v848_v62 }
 0x14a   :  { %v182_v2 = vpop.permute.xlu1 %181  ;;  %1480 = vmatmul.msk.f32.gmra.mxu0 %vm594_vm0, %v575_v1  ;;  %1491 = vmatmul.msk.f32.gmra.mxu3 %vm594_vm0, %v586_v59 }
 0x14b   :  { %v270_v3 = vmul.f32 %v1762_v35, %v182_v2  ;;  %v753_v5 = vpop.f32.mrf.mxu0 }
 0x14c   :  { %v754_v7 = vadd.f32 %v1971_v8, %v753_v5 }
 0x14d   :  { %v499_v0 = vadd.f32 %v461_v41, %v270_v3  ;;  %v192_v23 = vpop.permute.xlu2 %191 }
 0x14e   :  { %v849_v4 = vmax.f32 %v754_v7, 0.0  ;;  %v272_v15 = vmul.f32 %v1762_v35, %v192_v23 }
 0x14f   :  { %v538_v9 = vadd.f32 %v1778_v44, %v499_v0 }
 0x150   :  { %1503 = vmatmul.msk.f32.gmra.mxu1 %vm880_vm1, %v849_v4  ;;  %v501_v36 = vadd.f32 %v463_v32, %v272_v15 }
 0x151   :  { %v576_v12 = vmax.f32 %v538_v9, 0.0 }
 0x152   :  { %v237_v13 = vpop.permute.xlu1 %236  ;;  %v540_v45 = vadd.f32 %v1778_v44, %v501_v36 }
 0x153   :  { %v281_v16 = vmul.f32 %v1762_v35, %v237_v13  ;;  %v756_v6 = vpop.f32.mrf.mxu0  ;;  %1481 = vmatmul.msk.f32.gmra.mxu0 %vm594_vm0, %v576_v12 }
 0x154   :  { %v757_v17 = vadd.f32 %v1971_v8, %v756_v6  ;;  %v578_v54 = vmax.f32 %v540_v45, 0.0 }
 0x155   :  { %v510_v18 = vadd.f32 %v472_v14, %v281_v16 }
 0x156   :  { %v850_v19 = vmax.f32 %v757_v17, 0.0  ;;  %v397_v51 = vpop.permute.xlu2 %396 }
 0x157   :  { %v549_v20 = vadd.f32 %v1778_v44, %v510_v18  ;;  %v464_v56 = vmul.f32 %v1765_v37, %v397_v51 }
 0x158   :  { %1504 = vmatmul.msk.f32.gmra.mxu1 %vm880_vm1, %v850_v19 }
 0x159   :  { %v587_v21 = vmax.f32 %v549_v20, 0.0 }
 0x15b   :  { %v389_v26 = vpop.permute.xlu1 %388  ;;  %v759_v27 = vpop.f32.mrf.mxu0  ;;  %1492 = vmatmul.msk.f32.gmra.mxu3 %vm594_vm0, %v587_v21 }
 0x15c   :  { %v462_v28 = vmul.f32 %v1765_v37, %v389_v26  ;;  %v760_v29 = vadd.f32 %v1971_v8, %v759_v27 }
 0x15e   :  { %v500_v30 = vadd.f32 %v462_v28, %v271_v22  ;;  %v851_v31 = vmax.f32 %v760_v29, 0.0 }
 0x160   :  { %v539_v33 = vadd.f32 %v1778_v44, %v500_v30  ;;  %1505 = vmatmul.msk.f32.gmra.mxu1 %vm880_vm1, %v851_v31 }
 0x162   :  { %v577_v34 = vmax.f32 %v539_v33, 0.0 }
 0x163   :  { %v433_v38 = vpop.permute.xlu1 %432  ;;  %v762_v39 = vpop.f32.mrf.mxu0 }
 0x164   :  { %v473_v42 = vmul.f32 %v1765_v37, %v433_v38  ;;  %v763_v43 = vadd.f32 %v1971_v8, %v762_v39  ;;  %1482 = vmatmul.msk.f32.gmra.mxu0 %vm594_vm0, %v577_v34 }
 0x166   :  { %v511_v46 = vadd.f32 %v473_v42, %v282_v40  ;;  %v852_v48 = vmax.f32 %v763_v43, 0.0 }
 0x168   :  { %1506 = vmatmul.msk.f32.gmra.mxu1 %vm880_vm1, %v852_v48  ;;  %v550_v24 = vadd.f32 %v1778_v44, %v511_v46 }
 0x16a   :  { %v588_v52 = vmax.f32 %v550_v24, 0.0 }
 0x16b   :  { %v765_v55 = vpop.f32.mrf.mxu0 }
 0x16c   :  { %v766_v57 = vadd.f32 %v1971_v8, %v765_v55  ;;  %1483 = vmatmul.msk.f32.gmra.mxu0 %vm594_vm0, %v578_v54  ;;  %1493 = vmatmul.msk.f32.gmra.mxu3 %vm594_vm0, %v588_v52  ;;  %v197_v50 = vpop.permute.xlu1 %196 }
 0x16d   :  { %v273_v58 = vmul.f32 %v1762_v35, %v197_v50 }
 0x16e   :  { %v853_v60 = vmax.f32 %v766_v57, 0.0 }
 0x16f   :  { %v502_v47 = vadd.f32 %v464_v56, %v273_v58 }
 0x170   :  { %1507 = vmatmul.msk.f32.gmra.mxu1 %vm880_vm1, %v853_v60 }
 0x171   :  { %v541_v61 = vadd.f32 %v1778_v44, %v502_v47  ;;  %v2096_v44 = vld [vmem:[%s2413_s1 + $0xa] ss:$0 sm:$0xff] }
 0x173   :  { %v579_v62 = vmax.f32 %v541_v61, 0.0  ;;  %v768_v63 = vpop.f32.mrf.mxu0 }
 0x174   :  { %v769_v1 = vadd.f32 %v1971_v8, %v768_v63 }
 0x175   :  { %1484 = vmatmul.msk.f32.gmra.mxu0 %vm594_vm0, %v579_v62 }
 0x176   :  { %v854_v37 = vmax.f32 %v769_v1, 0.0 }
 0x178   :  { %1508 = vmatmul.msk.f32.gmra.mxu1 %vm880_vm1, %v854_v37 }
 0x17b   :  { %v771_v59 = vpop.f32.mrf.mxu0 }
 0x17c   :  { %v772_v41 = vadd.f32 %v1971_v8, %v771_v59 }
 0x17e   :  { %v855_v2 = vmax.f32 %v772_v41, 0.0 }
 0x180   :  { %1509 = vmatmul.msk.f32.gmra.mxu1 %vm880_vm1, %v855_v2 }
 0x181   :  { %v813_v35 = vpop.f32.mrf.mxu3 }
 0x182   :  { %v814_v3 = vadd.f32 %v1971_v8, %v813_v35 }
 0x183   :  { %v774_v5 = vpop.f32.mrf.mxu0 }
 0x184   :  { %v869_v7 = vmax.f32 %v814_v3, 0.0  ;;  %v775_v0 = vadd.f32 %v1971_v8, %v774_v5 }
 0x185   :  { %v1012_v4 = vpop.f32.mrf.mxu1 }
 0x186   :  { %v856_v9 = vmax.f32 %v775_v0, 0.0  ;;  %v1013_v10 = vadd.f32 %v2096_v44, %v1012_v4  ;;  %1523 = vmatmul.msk.f32.vlgmr.msrb.gmra.mxu3 %vm880_vm1, %v869_v7 }
 0x188   :  { %v1126_v11 = vmax.f32 %v1013_v10, 0.0  ;;  %1510 = vmatmul.msk.f32.gmra.mxu1 %vm880_vm1, %v856_v9 }
 0x189   :  { %v816_v12 = vpop.f32.mrf.mxu3 }
 0x18a   :  { %v817_v13 = vadd.f32 %v1971_v8, %v816_v12  ;;  %1532 = vmatmul.msk.f32.vlgmr.msra.gmra.mxu2 %vm1167_vm2, %v1126_v11 }
 0x18b   :  { %v777_v14 = vpop.f32.mrf.mxu0 }
 0x18c   :  { %v870_v16 = vmax.f32 %v817_v13, 0.0  ;;  %v778_v6 = vadd.f32 %v1971_v8, %v777_v14 }
 0x18d   :  { %v1015_v17 = vpop.f32.mrf.mxu1 }
 0x18e   :  { %v857_v18 = vmax.f32 %v778_v6, 0.0  ;;  %v1016_v19 = vadd.f32 %v2096_v44, %v1015_v17  ;;  %1524 = vmatmul.msk.f32.gmra.mxu3 %vm880_vm1, %v870_v16 }
 0x190   :  { %v1127_v20 = vmax.f32 %v1016_v19, 0.0  ;;  %1511 = vmatmul.msk.f32.gmra.mxu1 %vm880_vm1, %v857_v18 }
 0x192   :  { %1533 = vmatmul.msk.f32.gmra.mxu2 %vm1167_vm2, %v1127_v20 }
 0x193   :  { %v780_v21 = vpop.f32.mrf.mxu0 }
 0x194   :  { %v781_v22 = vadd.f32 %v1971_v8, %v780_v21 }
 0x195   :  { %v1018_v23 = vpop.f32.mrf.mxu1 }
 0x196   :  { %v858_v25 = vmax.f32 %v781_v22, 0.0  ;;  %v1019_v26 = vadd.f32 %v2096_v44, %v1018_v23 }
 0x198   :  { %v1128_v27 = vmax.f32 %v1019_v26, 0.0  ;;  %1512 = vmatmul.msk.f32.gmra.mxu1 %vm880_vm1, %v858_v25 }
 0x19a   :  { %v819_v28 = vpop.f32.mrf.mxu3  ;;  %1534 = vmatmul.msk.f32.gmra.mxu2 %vm1167_vm2, %v1128_v27 }
 0x19b   :  { %v820_v29 = vadd.f32 %v1971_v8, %v819_v28  ;;  %v783_v30 = vpop.f32.mrf.mxu0 }
 0x19c   :  { %v784_v31 = vadd.f32 %v1971_v8, %v783_v30 }
 0x19d   :  { %v871_v15 = vmax.f32 %v820_v29, 0.0  ;;  %v1021_v32 = vpop.f32.mrf.mxu1 }
 0x19e   :  { %v859_v33 = vmax.f32 %v784_v31, 0.0  ;;  %v1022_v34 = vadd.f32 %v2096_v44, %v1021_v32 }
 0x19f   :  { %1525 = vmatmul.msk.f32.gmra.mxu3 %vm880_vm1, %v871_v15 }
 0x1a0   :  { %v1129_v36 = vmax.f32 %v1022_v34, 0.0  ;;  %1513 = vmatmul.msk.f32.gmra.mxu1 %vm880_vm1, %v859_v33 }
 0x1a2   :  { %1535 = vmatmul.msk.f32.gmra.mxu2 %vm1167_vm2, %v1129_v36 }
 0x1a3   :  { %v786_v38 = vpop.f32.mrf.mxu0 }
 0x1a4   :  { %v787_v39 = vadd.f32 %v1971_v8, %v786_v38 }
 0x1a5   :  { %v1024_v40 = vpop.f32.mrf.mxu1 }
 0x1a6   :  { %v860_v42 = vmax.f32 %v787_v39, 0.0  ;;  %v1025_v43 = vadd.f32 %v2096_v44, %v1024_v40 }
 0x1a8   :  { %v1130_v45 = vmax.f32 %v1025_v43, 0.0  ;;  %1514 = vmatmul.msk.f32.gmra.mxu1 %vm880_vm1, %v860_v42 }
 0x1aa   :  { %1536 = vmatmul.msk.f32.gmra.mxu2 %vm1167_vm2, %v1130_v45 }
 0x1ab   :  { %v789_v46 = vpop.f32.mrf.mxu0  ;;  %v822_v48 = vpop.f32.mrf.mxu3 }
 0x1ac   :  { %v790_v49 = vadd.f32 %v1971_v8, %v789_v46  ;;  %v823_v24 = vadd.f32 %v1971_v8, %v822_v48 }
 0x1ad   :  { %v1027_v51 = vpop.f32.mrf.mxu1 }
 0x1ae   :  { %v861_v53 = vmax.f32 %v790_v49, 0.0  ;;  %v872_v54 = vmax.f32 %v823_v24, 0.0  ;;  %v1028_v52 = vadd.f32 %v2096_v44, %v1027_v51 }
 0x1b0   :  { %v1131_v55 = vmax.f32 %v1028_v52, 0.0  ;;  %1515 = vmatmul.msk.f32.gmra.mxu1 %vm880_vm1, %v861_v53  ;;  %1526 = vmatmul.msk.f32.gmra.mxu3 %vm880_vm1, %v872_v54 }
 0x1b2   :  { %1537 = vmatmul.msk.f32.gmra.mxu2 %vm1167_vm2, %v1131_v55 }
 0x1b3   :  { %v792_v56 = vpop.f32.mrf.mxu0 }
 0x1b4   :  { %v793_v57 = vadd.f32 %v1971_v8, %v792_v56  ;;  %v825_v50 = vpop.f32.mrf.mxu3 }
 0x1b5   :  { %v826_v58 = vadd.f32 %v1971_v8, %v825_v50  ;;  %v1030_v60 = vpop.f32.mrf.mxu1 }
 0x1b6   :  { %v862_v47 = vmax.f32 %v793_v57, 0.0  ;;  %v1031_v61 = vadd.f32 %v2096_v44, %v1030_v60 }
 0x1b7   :  { %v873_v62 = vmax.f32 %v826_v58, 0.0 }
 0x1b8   :  { %v1132_v63 = vmax.f32 %v1031_v61, 0.0  ;;  %1516 = vmatmul.msk.f32.gmra.mxu1 %vm880_vm1, %v862_v47 }
 0x1b9   :  { %1527 = vmatmul.msk.f32.gmra.mxu3 %vm880_vm1, %v873_v62 }
 0x1ba   :  { %1538 = vmatmul.msk.f32.gmra.mxu2 %vm1167_vm2, %v1132_v63  ;;  %v2179_v63 = vld [vmem:[%s2413_s1 + $0xb] ss:$0 sm:$0xff] }
 0x1bb   :  { %v795_v1 = vpop.f32.mrf.mxu0 }
 0x1bc   :  { %v796_v37 = vadd.f32 %v1971_v8, %v795_v1 }
 0x1bd   :  { %v1033_v59 = vpop.f32.mrf.mxu1 }
 0x1be   :  { %v863_v41 = vmax.f32 %v796_v37, 0.0  ;;  %v1034_v2 = vadd.f32 %v2096_v44, %v1033_v59 }
 0x1c0   :  { %v1133_v35 = vmax.f32 %v1034_v2, 0.0  ;;  %1517 = vmatmul.msk.f32.gmra.mxu1 %vm880_vm1, %v863_v41 }
 0x1c2   :  { %1539 = vmatmul.msk.f32.gmra.mxu2 %vm1167_vm2, %v1133_v35 }
 0x1c5   :  { %v828_v3 = vpop.f32.mrf.mxu3  ;;  %v1036_v5 = vpop.f32.mrf.mxu1 }
 0x1c6   :  { %v829_v7 = vadd.f32 %v1971_v8, %v828_v3  ;;  %v1037_v0 = vadd.f32 %v2096_v44, %v1036_v5 }
 0x1c7   :  { %v798_v4 = vpop.f32.mrf.mxu0 }
 0x1c8   :  { %v874_v9 = vmax.f32 %v829_v7, 0.0  ;;  %v1134_v10 = vmax.f32 %v1037_v0, 0.0  ;;  %v799_v11 = vadd.f32 %v1971_v8, %v798_v4 }
 0x1ca   :  { %v864_v12 = vmax.f32 %v799_v11, 0.0  ;;  %1528 = vmatmul.msk.f32.gmra.mxu3 %vm880_vm1, %v874_v9  ;;  %1540 = vmatmul.msk.f32.gmra.mxu2 %vm1167_vm2, %v1134_v10 }
 0x1cc   :  { %1518 = vmatmul.msk.f32.gmra.mxu1 %vm880_vm1, %v864_v12 }
 0x1cd   :  { %v831_v13 = vpop.f32.mrf.mxu3  ;;  %v1039_v14 = vpop.f32.mrf.mxu1 }
 0x1ce   :  { %v832_v16 = vadd.f32 %v1971_v8, %v831_v13  ;;  %v1040_v6 = vadd.f32 %v2096_v44, %v1039_v14 }
 0x1d0   :  { %v875_v17 = vmax.f32 %v832_v16, 0.0  ;;  %v1135_v18 = vmax.f32 %v1040_v6, 0.0  ;;  %v801_v19 = vpop.f32.mrf.mxu0 }
 0x1d1   :  { %v802_v20 = vadd.f32 %v1971_v8, %v801_v19 }
 0x1d2   :  { %1529 = vmatmul.msk.f32.gmra.mxu3 %vm880_vm1, %v875_v17  ;;  %1541 = vmatmul.msk.f32.gmra.mxu2 %vm1167_vm2, %v1135_v18 }
 0x1d3   :  { %v865_v21 = vmax.f32 %v802_v20, 0.0 }
 0x1d5   :  { %v1042_v22 = vpop.f32.mrf.mxu1  ;;  %1519 = vmatmul.msk.f32.gmra.mxu1 %vm880_vm1, %v865_v21 }
 0x1d6   :  { %v1043_v23 = vadd.f32 %v2096_v44, %v1042_v22 }
 0x1d8   :  { %v1136_v25 = vmax.f32 %v1043_v23, 0.0 }
 0x1da   :  { %1542 = vmatmul.msk.f32.gmra.mxu2 %vm1167_vm2, %v1136_v25 }
 0x1dd   :  { %v1045_v26 = vpop.f32.mrf.mxu1 }
 0x1de   :  { %v1046_v27 = vadd.f32 %v2096_v44, %v1045_v26  ;;  %v834_v28 = vpop.f32.mrf.mxu3 }
 0x1df   :  { %v835_v29 = vadd.f32 %v1971_v8, %v834_v28 }
 0x1e0   :  { %v1137_v30 = vmax.f32 %v1046_v27, 0.0 }
 0x1e1   :  { %v876_v31 = vmax.f32 %v835_v29, 0.0  ;;  %v804_v15 = vpop.f32.mrf.mxu0 }
 0x1e2   :  { %v805_v32 = vadd.f32 %v1971_v8, %v804_v15  ;;  %1543 = vmatmul.msk.f32.gmra.mxu2 %vm1167_vm2, %v1137_v30 }
 0x1e3   :  { %1530 = vmatmul.msk.f32.gmra.mxu3 %vm880_vm1, %v876_v31 }
 0x1e4   :  { %v866_v33 = vmax.f32 %v805_v32, 0.0 }
 0x1e5   :  { %v1048_v34 = vpop.f32.mrf.mxu1 }
 0x1e6   :  { %v1049_v36 = vadd.f32 %v2096_v44, %v1048_v34  ;;  %1520 = vmatmul.msk.f32.gmra.mxu1 %vm880_vm1, %v866_v33 }
 0x1e8   :  { %v1138_v38 = vmax.f32 %v1049_v36, 0.0 }
 0x1e9   :  { %v807_v39 = vpop.f32.mrf.mxu0 }
 0x1ea   :  { %v808_v40 = vadd.f32 %v1971_v8, %v807_v39  ;;  %1544 = vmatmul.msk.f32.gmra.mxu2 %vm1167_vm2, %v1138_v38 }
 0x1ec   :  { %v867_v42 = vmax.f32 %v808_v40, 0.0 }
 0x1ed   :  { %v1051_v43 = vpop.f32.mrf.mxu1 }
 0x1ee   :  { %v1052_v45 = vadd.f32 %v2096_v44, %v1051_v43  ;;  %1521 = vmatmul.msk.f32.gmra.mxu1 %vm880_vm1, %v867_v42 }
 0x1ef   :  { %v837_v46 = vpop.f32.mrf.mxu3 }
 0x1f0   :  { %v1139_v48 = vmax.f32 %v1052_v45, 0.0  ;;  %v838_v49 = vadd.f32 %v1971_v8, %v837_v46 }
 0x1f2   :  { %v877_v24 = vmax.f32 %v838_v49, 0.0  ;;  %1545 = vmatmul.msk.f32.gmra.mxu2 %vm1167_vm2, %v1139_v48  ;;  %v810_v51 = vpop.f32.mrf.mxu0 }
 0x1f3   :  { %v811_v53 = vadd.f32 %v1971_v8, %v810_v51 }
 0x1f4   :  { %1531 = vmatmul.msk.f32.gmra.mxu3 %vm880_vm1, %v877_v24 }
 0x1f5   :  { %v868_v54 = vmax.f32 %v811_v53, 0.0  ;;  %v1054_v52 = vpop.f32.mrf.mxu1 }
 0x1f6   :  { %v1055_v55 = vadd.f32 %v2096_v44, %v1054_v52 }
 0x1f7   :  { %1522 = vmatmul.msk.f32.gmra.mxu1 %vm880_vm1, %v868_v54 }
 0x1f8   :  { %v1140_v56 = vmax.f32 %v1055_v55, 0.0 }
 0x1fa   :  { %1546 = vmatmul.msk.f32.gmra.mxu2 %vm1167_vm2, %v1140_v56 }
 0x1fd   :  { %v1057_v57 = vpop.f32.mrf.mxu1 }
 0x1fe   :  { %v1058_v50 = vadd.f32 %v2096_v44, %v1057_v57 }
 0x200   :  { %v1141_v58 = vmax.f32 %v1058_v50, 0.0 }
 0x202   :  { %1547 = vmatmul.msk.f32.gmra.mxu2 %vm1167_vm2, %v1141_v58 }
 0x205   :  { %v1060_v60 = vpop.f32.mrf.mxu1 }
 0x206   :  { %v1061_v8 = vadd.f32 %v2096_v44, %v1060_v60 }
 0x208   :  { %v1142_v47 = vmax.f32 %v1061_v8, 0.0 }
 0x209   :  { %v1099_v61 = vpop.f32.mrf.mxu3 }
 0x20a   :  { %v1100_v62 = vadd.f32 %v2096_v44, %v1099_v61  ;;  %1548 = vmatmul.msk.f32.gmra.mxu2 %vm1167_vm2, %v1142_v47 }
 0x20c   :  { %v1155_v1 = vmax.f32 %v1100_v62, 0.0 }
 0x20d   :  { %v1063_v37 = vpop.f32.mrf.mxu1  ;;  %v1299_v59 = vpop.f32.mrf.mxu2 }
 0x20e   :  { %v1064_v41 = vadd.f32 %v2096_v44, %v1063_v37  ;;  %v1300_v2 = vadd.f32 %v2179_v63, %v1299_v59  ;;  %1561 = vmatmul.msk.f32.vlgmr.msra.gmra.mxu3 %vm1167_vm2, %v1155_v1 }
 0x210   :  { %v1143_v35 = vmax.f32 %v1064_v41, 0.0  ;;  %1414 = vst.msk [vmem:[%s2414_s2] sm:$0xff] %vm1413_vm3, %v1300_v2 }
 0x211   :  { %v1102_v3 = vpop.f32.mrf.mxu3 }
 0x212   :  { %v1103_v5 = vadd.f32 %v2096_v44, %v1102_v3  ;;  %1549 = vmatmul.msk.f32.gmra.mxu2 %vm1167_vm2, %v1143_v35 }
 0x214   :  { %v1156_v7 = vmax.f32 %v1103_v5, 0.0 }
 0x215   :  { %v1066_v0 = vpop.f32.mrf.mxu1  ;;  %v1302_v4 = vpop.f32.mrf.mxu2 }
 0x216   :  { %v1067_v9 = vadd.f32 %v2096_v44, %v1066_v0  ;;  %v1303_v10 = vadd.f32 %v2179_v63, %v1302_v4  ;;  %1562 = vmatmul.msk.f32.gmra.mxu3 %vm1167_vm2, %v1156_v7 }
 0x218   :  { %v1144_v11 = vmax.f32 %v1067_v9, 0.0  ;;  %1415 = vst.msk [vmem:[%s2414_s2 + $0x8] sm:$0xff] %vm1413_vm3, %v1303_v10 }
 0x21a   :  { %1550 = vmatmul.msk.f32.gmra.mxu2 %vm1167_vm2, %v1144_v11 }
 0x21d   :  { %v1069_v12 = vpop.f32.mrf.mxu1  ;;  %v1305_v13 = vpop.f32.mrf.mxu2 }
 0x21e   :  { %v1070_v14 = vadd.f32 %v2096_v44, %v1069_v12  ;;  %v1306_v16 = vadd.f32 %v2179_v63, %v1305_v13 }
 0x220   :  { %v1145_v6 = vmax.f32 %v1070_v14, 0.0  ;;  %1416 = vst.msk [vmem:[%s2414_s2 + $0x10] sm:$0xff] %vm1413_vm3, %v1306_v16 }
 0x222   :  { %v1105_v17 = vpop.f32.mrf.mxu3  ;;  %1551 = vmatmul.msk.f32.gmra.mxu2 %vm1167_vm2, %v1145_v6 }
 0x223   :  { %v1106_v18 = vadd.f32 %v2096_v44, %v1105_v17 }
 0x225   :  { %v1157_v19 = vmax.f32 %v1106_v18, 0.0  ;;  %v1072_v20 = vpop.f32.mrf.mxu1  ;;  %v1308_v21 = vpop.f32.mrf.mxu2 }
 0x226   :  { %v1073_v22 = vadd.f32 %v2096_v44, %v1072_v20  ;;  %v1309_v23 = vadd.f32 %v2179_v63, %v1308_v21 }
 0x227   :  { %1563 = vmatmul.msk.f32.gmra.mxu3 %vm1167_vm2, %v1157_v19 }
 0x228   :  { %v1146_v25 = vmax.f32 %v1073_v22, 0.0  ;;  %1417 = vst.msk [vmem:[%s2414_s2 + $0x18] sm:$0xff] %vm1413_vm3, %v1309_v23 }
 0x22a   :  { %1552 = vmatmul.msk.f32.gmra.mxu2 %vm1167_vm2, %v1146_v25 }
 0x22d   :  { %v1075_v26 = vpop.f32.mrf.mxu1  ;;  %v1311_v27 = vpop.f32.mrf.mxu2 }
 0x22e   :  { %v1076_v28 = vadd.f32 %v2096_v44, %v1075_v26  ;;  %v1312_v29 = vadd.f32 %v2179_v63, %v1311_v27 }
 0x230   :  { %v1147_v30 = vmax.f32 %v1076_v28, 0.0  ;;  %1418 = vst.msk [vmem:[%s2414_s2 + $0x20] sm:$0xff] %vm1413_vm3, %v1312_v29 }
 0x232   :  { %1553 = vmatmul.msk.f32.gmra.mxu2 %vm1167_vm2, %v1147_v30 }
 0x233   :  { %v1108_v31 = vpop.f32.mrf.mxu3 }
 0x234   :  { %v1109_v15 = vadd.f32 %v2096_v44, %v1108_v31 }
 0x235   :  { %v1078_v32 = vpop.f32.mrf.mxu1  ;;  %v1314_v33 = vpop.f32.mrf.mxu2 }
 0x236   :  { %v1158_v34 = vmax.f32 %v1109_v15, 0.0  ;;  %v1079_v36 = vadd.f32 %v2096_v44, %v1078_v32  ;;  %v1315_v38 = vadd.f32 %v2179_v63, %v1314_v33 }
 0x238   :  { %v1148_v39 = vmax.f32 %v1079_v36, 0.0  ;;  %1419 = vst.msk [vmem:[%s2414_s2 + $0x28] sm:$0xff] %vm1413_vm3, %v1315_v38  ;;  %1564 = vmatmul.msk.f32.gmra.mxu3 %vm1167_vm2, %v1158_v34 }
 0x23a   :  { %1554 = vmatmul.msk.f32.gmra.mxu2 %vm1167_vm2, %v1148_v39 }
 0x23c   :  { %v1111_v40 = vpop.f32.mrf.mxu3 }
 0x23d   :  { %v1112_v42 = vadd.f32 %v2096_v44, %v1111_v40  ;;  %v1081_v43 = vpop.f32.mrf.mxu1  ;;  %v1317_v45 = vpop.f32.mrf.mxu2 }
 0x23e   :  { %v1082_v46 = vadd.f32 %v2096_v44, %v1081_v43  ;;  %v1318_v48 = vadd.f32 %v2179_v63, %v1317_v45 }
 0x23f   :  { %v1159_v49 = vmax.f32 %v1112_v42, 0.0 }
 0x240   :  { %v1149_v24 = vmax.f32 %v1082_v46, 0.0  ;;  %1420 = vst.msk [vmem:[%s2414_s2 + $0x30] sm:$0xff] %vm1413_vm3, %v1318_v48 }
 0x241   :  { %1565 = vmatmul.msk.f32.gmra.mxu3 %vm1167_vm2, %v1159_v49 }
 0x242   :  { %1555 = vmatmul.msk.f32.gmra.mxu2 %vm1167_vm2, %v1149_v24 }
 0x245   :  { %v1320_v51 = vpop.f32.mrf.mxu2 }
 0x246   :  { %v1321_v53 = vadd.f32 %v2179_v63, %v1320_v51 }
 0x248   :  { %1421 = vst.msk [vmem:[%s2414_s2 + $0x38] sm:$0xff] %vm1413_vm3, %v1321_v53 }
 0x249   :  { %v1084_v54 = vpop.f32.mrf.mxu1 }
 0x24a   :  { %v1085_v52 = vadd.f32 %v2096_v44, %v1084_v54 }
 0x24c   :  { %v1150_v55 = vmax.f32 %v1085_v52, 0.0 }
 0x24d   :  { %v1114_v56 = vpop.f32.mrf.mxu3  ;;  %v1323_v57 = vpop.f32.mrf.mxu2 }
 0x24e   :  { %v1115_v50 = vadd.f32 %v2096_v44, %v1114_v56  ;;  %v1324_v58 = vadd.f32 %v2179_v63, %v1323_v57  ;;  %1556 = vmatmul.msk.f32.gmra.mxu2 %vm1167_vm2, %v1150_v55 }
 0x250   :  { %v1160_v60 = vmax.f32 %v1115_v50, 0.0  ;;  %1422 = vst.msk [vmem:[%s2414_s2 + $0x40] sm:$0xff] %vm1413_vm3, %v1324_v58 }
 0x252   :  { %v1087_v8 = vpop.f32.mrf.mxu1  ;;  %1566 = vmatmul.msk.f32.gmra.mxu3 %vm1167_vm2, %v1160_v60 }
 0x253   :  { %v1088_v47 = vadd.f32 %v2096_v44, %v1087_v8 }
 0x255   :  { %v1151_v61 = vmax.f32 %v1088_v47, 0.0  ;;  %v1117_v62 = vpop.f32.mrf.mxu3  ;;  %v1326_v1 = vpop.f32.mrf.mxu2 }
 0x256   :  { %v1118_v37 = vadd.f32 %v2096_v44, %v1117_v62  ;;  %v1327_v59 = vadd.f32 %v2179_v63, %v1326_v1 }
 0x257   :  { %1557 = vmatmul.msk.f32.gmra.mxu2 %vm1167_vm2, %v1151_v61 }
 0x258   :  { %v1161_v41 = vmax.f32 %v1118_v37, 0.0  ;;  %1423 = vst.msk [vmem:[%s2414_s2 + $0x48] sm:$0xff] %vm1413_vm3, %v1327_v59 }
 0x25a   :  { %1567 = vmatmul.msk.f32.gmra.mxu3 %vm1167_vm2, %v1161_v41 }
 0x25d   :  { %v1329_v2 = vpop.f32.mrf.mxu2 }
 0x25e   :  { %v1330_v35 = vadd.f32 %v2179_v63, %v1329_v2 }
 0x260   :  { %1424 = vst.msk [vmem:[%s2414_s2 + $0x50] sm:$0xff] %vm1413_vm3, %v1330_v35 }
 0x263   :  { %v1090_v3 = vpop.f32.mrf.mxu1 }
 0x264   :  { %v1091_v5 = vadd.f32 %v2096_v44, %v1090_v3 }
 0x265   :  { %v1332_v7 = vpop.f32.mrf.mxu2 }
 0x266   :  { %v1152_v0 = vmax.f32 %v1091_v5, 0.0  ;;  %v1333_v4 = vadd.f32 %v2179_v63, %v1332_v7  ;;  %v1120_v9 = vpop.f32.mrf.mxu3 }
 0x267   :  { %v1121_v10 = vadd.f32 %v2096_v44, %v1120_v9 }
 0x268   :  { %1425 = vst.msk [vmem:[%s2414_s2 + $0x58] sm:$0xff] %vm1413_vm3, %v1333_v4  ;;  %1558 = vmatmul.msk.f32.gmra.mxu2 %vm1167_vm2, %v1152_v0 }
 0x269   :  { %v1162_v11 = vmax.f32 %v1121_v10, 0.0 }
 0x26b   :  { %v1093_v12 = vpop.f32.mrf.mxu1  ;;  %1568 = vmatmul.msk.f32.gmra.mxu3 %vm1167_vm2, %v1162_v11 }
 0x26c   :  { %v1094_v13 = vadd.f32 %v2096_v44, %v1093_v12 }
 0x26d   :  { %v1335_v14 = vpop.f32.mrf.mxu2 }
 0x26e   :  { %v1153_v16 = vmax.f32 %v1094_v13, 0.0  ;;  %v1336_v6 = vadd.f32 %v2179_v63, %v1335_v14 }
 0x270   :  { %1426 = vst.msk [vmem:[%s2414_s2 + $0x60] sm:$0xff] %vm1413_vm3, %v1336_v6  ;;  %1559 = vmatmul.msk.f32.gmra.mxu2 %vm1167_vm2, %v1153_v16 }
 0x274   :  { %v1096_v17 = vpop.f32.mrf.mxu1 }
 0x275   :  { %v1338_v18 = vpop.f32.mrf.mxu2  ;;  %v1097_v19 = vadd.f32 %v2096_v44, %v1096_v17 }
 0x276   :  { %v1339_v20 = vadd.f32 %v2179_v63, %v1338_v18 }
 0x277   :  { %v1154_v21 = vmax.f32 %v1097_v19, 0.0  ;;  %v1123_v22 = vpop.f32.mrf.mxu3 }
 0x278   :  { %1427 = vst.msk [vmem:[%s2414_s2 + $0x68] sm:$0xff] %vm1413_vm3, %v1339_v20  ;;  %v1124_v23 = vadd.f32 %v2096_v44, %v1123_v22 }
 0x279   :  { %1560 = vmatmul.msk.f32.gmra.mxu2 %vm1167_vm2, %v1154_v21 }
 0x27a   :  { %v1163_v25 = vmax.f32 %v1124_v23, 0.0 }
 0x27c   :  { %1569 = vmatmul.msk.f32.gmra.mxu3 %vm1167_vm2, %v1163_v25 }
 0x27d   :  { %v1341_v26 = vpop.f32.mrf.mxu2 }
 0x27e   :  { %v1342_v27 = vadd.f32 %v2179_v63, %v1341_v26 }
 0x280   :  { %1428 = vst.msk [vmem:[%s2414_s2 + $0x70] sm:$0xff] %vm1413_vm3, %v1342_v27 }
 0x285   :  { %v1344_v28 = vpop.f32.mrf.mxu2 }
 0x286   :  { %v1345_v29 = vadd.f32 %v2179_v63, %v1344_v28 }
 0x288   :  { %1429 = vst.msk [vmem:[%s2414_s2 + $0x78] sm:$0xff] %vm1413_vm3, %v1345_v29 }
 0x28d   :  { %v1347_v44 = vpop.f32.mrf.mxu2 }
 0x28e   :  { %v1348_v30 = vadd.f32 %v2179_v63, %v1347_v44 }
 0x290   :  { %1430 = vst.msk [vmem:[%s2414_s2 + $0x80] sm:$0xff] %vm1413_vm3, %v1348_v30 }
 0x291   :  { %v1386_v31 = vpop.f32.mrf.mxu3 }
 0x292   :  { %v1387_v15 = vadd.f32 %v2179_v63, %v1386_v31 }
 0x294   :  { %1443 = vst.msk [vmem:[%s2414_s2 + $0xe8] sm:$0xff] %vm1413_vm3, %v1387_v15 }
 0x295   :  { %v1350_v32 = vpop.f32.mrf.mxu2 }
 0x296   :  { %v1351_v33 = vadd.f32 %v2179_v63, %v1350_v32 }
 0x298   :  { %1431 = vst.msk [vmem:[%s2414_s2 + $0x88] sm:$0xff] %vm1413_vm3, %v1351_v33 }
 0x299   :  { %v1389_v34 = vpop.f32.mrf.mxu3 }
 0x29a   :  { %v1390_v36 = vadd.f32 %v2179_v63, %v1389_v34 }
 0x29c   :  { %1444 = vst.msk [vmem:[%s2414_s2 + $0xf0] sm:$0xff] %vm1413_vm3, %v1390_v36 }
 0x29d   :  { %v1353_v38 = vpop.f32.mrf.mxu2 }
 0x29e   :  { %v1354_v39 = vadd.f32 %v2179_v63, %v1353_v38 }
 0x2a0   :  { %1432 = vst.msk [vmem:[%s2414_s2 + $0x90] sm:$0xff] %vm1413_vm3, %v1354_v39 }
 0x2a5   :  { %v1356_v40 = vpop.f32.mrf.mxu2 }
 0x2a6   :  { %v1357_v42 = vadd.f32 %v2179_v63, %v1356_v40 }
 0x2a8   :  { %1433 = vst.msk [vmem:[%s2414_s2 + $0x98] sm:$0xff] %vm1413_vm3, %v1357_v42 }
 0x2aa   :  { %v1392_v43 = vpop.f32.mrf.mxu3 }
 0x2ab   :  { %v1393_v45 = vadd.f32 %v2179_v63, %v1392_v43 }
 0x2ad   :  { %1445 = vst.msk [vmem:[%s2414_s2 + $0xf8] sm:$0xff] %vm1413_vm3, %v1393_v45  ;;  %v1359_v46 = vpop.f32.mrf.mxu2 }
 0x2ae   :  { %v1360_v48 = vadd.f32 %v2179_v63, %v1359_v46 }
 0x2b0   :  { %1434 = vst.msk [vmem:[%s2414_s2 + $0xa0] sm:$0xff] %vm1413_vm3, %v1360_v48 }
 0x2b5   :  { %v1362_v49 = vpop.f32.mrf.mxu2 }
 0x2b6   :  { %v1363_v24 = vadd.f32 %v2179_v63, %v1362_v49 }
 0x2b8   :  { %1435 = vst.msk [vmem:[%s2414_s2 + $0xa8] sm:$0xff] %vm1413_vm3, %v1363_v24 }
 0x2bb   :  { %v1395_v51 = vpop.f32.mrf.mxu3 }
 0x2bc   :  { %v1396_v53 = vadd.f32 %v2179_v63, %v1395_v51 }
 0x2bd   :  { %v1365_v54 = vpop.f32.mrf.mxu2 }
 0x2be   :  { %1446 = vst.msk [vmem:[%s2414_s2 + $0x100] sm:$0xff] %vm1413_vm3, %v1396_v53  ;;  %v1366_v52 = vadd.f32 %v2179_v63, %v1365_v54 }
 0x2c0   :  { %1436 = vst.msk [vmem:[%s2414_s2 + $0xb0] sm:$0xff] %vm1413_vm3, %v1366_v52 }
 0x2c4   :  { %v1398_v55 = vpop.f32.mrf.mxu3 }
 0x2c5   :  { %v1399_v56 = vadd.f32 %v2179_v63, %v1398_v55  ;;  %v1368_v57 = vpop.f32.mrf.mxu2 }
 0x2c6   :  { %v1369_v50 = vadd.f32 %v2179_v63, %v1368_v57 }
 0x2c7   :  { %1447 = vst.msk [vmem:[%s2414_s2 + $0x108] sm:$0xff] %vm1413_vm3, %v1399_v56 }
 0x2c8   :  { %1437 = vst.msk [vmem:[%s2414_s2 + $0xb8] sm:$0xff] %vm1413_vm3, %v1369_v50 }
 0x2d1   :  { %v1371_v58 = vpop.f32.mrf.mxu2 }
 0x2d2   :  { %v1372_v60 = vadd.f32 %v2179_v63, %v1371_v58 }
 0x2d4   :  { %1438 = vst.msk [vmem:[%s2414_s2 + $0xc0] sm:$0xff] %vm1413_vm3, %v1372_v60 }
 0x2d5   :  { %v1401_v8 = vpop.f32.mrf.mxu3 }
 0x2d6   :  { %v1402_v47 = vadd.f32 %v2179_v63, %v1401_v8 }
 0x2d8   :  { %1448 = vst.msk [vmem:[%s2414_s2 + $0x110] sm:$0xff] %vm1413_vm3, %v1402_v47 }
 0x2da   :  { %v1374_v61 = vpop.f32.mrf.mxu2 }
 0x2db   :  { %v1375_v62 = vadd.f32 %v2179_v63, %v1374_v61 }
 0x2dd   :  { %1439 = vst.msk [vmem:[%s2414_s2 + $0xc8] sm:$0xff] %vm1413_vm3, %v1375_v62  ;;  %v1404_v1 = vpop.f32.mrf.mxu3 }
 0x2de   :  { %v1405_v37 = vadd.f32 %v2179_v63, %v1404_v1 }
 0x2e0   :  { %1449 = vst.msk [vmem:[%s2414_s2 + $0x118] sm:$0xff] %vm1413_vm3, %v1405_v37 }
 0x2eb   :  { %v1377_v59 = vpop.f32.mrf.mxu2 }
 0x2ec   :  { %v1378_v41 = vadd.f32 %v2179_v63, %v1377_v59 }
 0x2ee   :  { %1440 = vst.msk [vmem:[%s2414_s2 + $0xd0] sm:$0xff] %vm1413_vm3, %v1378_v41  ;;  %v1407_v2 = vpop.f32.mrf.mxu3 }
 0x2ef   :  { %v1408_v35 = vadd.f32 %v2179_v63, %v1407_v2 }
 0x2f1   :  { %1450 = vst.msk [vmem:[%s2414_s2 + $0x120] sm:$0xff] %vm1413_vm3, %v1408_v35 }
 0x2f3   :  { %v1380_v3 = vpop.f32.mrf.mxu2 }
 0x2f4   :  { %v1381_v5 = vadd.f32 %v2179_v63, %v1380_v3 }
 0x2f6   :  { %1441 = vst.msk [vmem:[%s2414_s2 + $0xd8] sm:$0xff] %vm1413_vm3, %v1381_v5 }
 0x2fc   :  { %v1383_v7 = vpop.f32.mrf.mxu2 }
 0x2fd   :  { %v1384_v0 = vadd.f32 %v2179_v63, %v1383_v7 }
 0x2ff   :  { %1442 = vst.msk [vmem:[%s2414_s2 + $0xe0] sm:$0xff] %vm1413_vm3, %v1384_v0  ;;  %v1410_v4 = vpop.f32.mrf.mxu3 }
 0x300   :  { %v1411_v9 = vadd.f32 %v2179_v63, %v1410_v4 }
 0x302   :  { %1451 = vst.msk [vmem:[%s2414_s2 + $0x128] sm:$0xff] %vm1413_vm3, %v1411_v9 }

</bundles_post_ra>
